<compile_context>
chip_gen: v5e
topology: v5e:2x2
jax: 0.10.0
libtpu: 0.0.40
codegen_flags: <defaults>
</compile_context>

<pallas_src>
import math

import jax
import jax.numpy as jnp
from jax import lax
from jax.experimental import pallas as pl
from jax.experimental.pallas import tpu as pltpu  # noqa: F401  (TPU backend)


def _softplus(x):
    # numerically-stable softplus using only exp/log (Mosaic-friendly)
    return jnp.maximum(x, 0.0) + jnp.log(1.0 + jnp.exp(-jnp.abs(x)))


# ----------------------------------------------------------------------------
# Pallas kernel wrapper
# ----------------------------------------------------------------------------
def idanse_forward_pallas(Yi, Xhat, Cw, H, mu_w, params):
    """Returns scalar log_pYT_batch_avg (same semantics as IDANSE.forward)."""
    N, T, n_obs = Yi.shape
    n_states = Xhat.shape[2]
    hid = params["W_hh"].shape[0]
    dense = params["W_fc"].shape[1]
    P = N * T                                   # flattened (t, n) rows, p = t*N + n
    n_in = n_obs + n_states
    nsq = n_obs * n_obs
    f32 = jnp.float32

    # ---------------- wrapper-side packing (layout plumbing only) ------------
    # data slab: [ [y|x] | y | flattened Cw per row ]  -> (P, n_in + n_obs + nsq)
    yx = jnp.concatenate([Yi, Xhat], axis=-1)
    yx_flat = jnp.transpose(yx, (1, 0, 2)).reshape(P, n_in)
    y_flat = jnp.transpose(Yi, (1, 0, 2)).reshape(P, n_obs)
    Cw_rep = jnp.tile(Cw.reshape(N, nsq), (T, 1))
    data = jnp.concatenate([yx_flat, y_flat, Cw_rep], axis=-1)

    # fold the mean head through H and mu_w (exact), fuse with the var head
    Ht = jnp.transpose(H)                                         # (n_states, n_obs)
    W_mu_y = params["W_mu"] @ Ht                                   # (dense, n_obs)
    b_mu_y = params["b_mu"] @ Ht + mu_w.reshape(1, n_obs)          # (1, n_obs)
    W_heads = jnp.concatenate([W_mu_y, params["W_var"]], axis=1)   # (dense, n_obs+n_states)
    b_heads = jnp.concatenate([b_mu_y, params["b_var"]], axis=1)   # (1, n_obs+n_states)

    W_ih = jnp.concatenate([params["W_ih_y"], params["W_ih_x"]], axis=0)  # (n_in, 3*hid)

    # one weight slab: rows concatenated, cols zero-padded to 3*hid
    maxc = max(3 * hid, dense, n_in)

    def padc(w):
        return jnp.pad(w, ((0, 0), (0, maxc - w.shape[1])))

    W_slab = jnp.concatenate(
        [padc(W_ih), padc(params["W_hh"]), padc(params["W_fc"]), padc(W_heads)], axis=0)
    # one bias slab: one row per bias vector, zero-padded lanes
    b_slab = jnp.concatenate(
        [padc(params["b_ih"]), padc(params["b_hh"]),
         padc(params["b_fc"]), padc(b_heads)], axis=0)             # (4, 3*hid)

    # constants slab: HHt (so var @ HHt = flattened H diag(var) H^T) and the
    # repeat-interleave lane-expansion matrix E for the elimination update.
    HHt = (H[:, None, :] * H[None, :, :]).reshape(nsq, n_states).T     # (n_states, nsq)
    idx = jnp.arange(nsq)
    rows = jnp.arange(n_obs)[:, None]
    E_mat = (idx[None, :] // n_obs == rows).astype(f32)                # (n_obs, nsq)
    consts = jnp.concatenate([HHt, E_mat], axis=0)                     # (n_states+n_obs, nsq)

    # static row offsets into the weight slab
    r_ih, r_hh, r_fc, r_hd = 0, n_in, n_in + hid, n_in + 2 * hid
    r_end = n_in + 2 * hid + dense

    def kernel(data_ref, w_ref, b_ref, c_ref, out_ref):
        d = data_ref[...]
        yx_v = d[:, 0:n_in]
        y_v = d[:, n_in:n_in + n_obs]
        cw_v = d[:, n_in + n_obs:n_in + n_obs + nsq]

        W = w_ref[...]
        w_ih = W[r_ih:r_hh, 0:3 * hid]
        w_hh = W[r_hh:r_fc, 0:3 * hid]
        w_fc = W[r_fc:r_hd, 0:dense]
        w_hd = W[r_hd:r_end, 0:n_obs + n_states]

        B = b_ref[...]
        b_ih = B[0:1, 0:3 * hid]
        b_hh = B[1:2, 0:3 * hid]
        b_fc = B[2:3, 0:dense]
        b_hd = B[3:4, 0:n_obs + n_states]

        C = c_ref[...]
        hht = C[0:n_states, :]
        E = C[n_states:n_states + n_obs, :]

        # ---------------- phase 1: sequential GRU recurrence -----------------
        # one input->hidden matmul for all (t, n) at once
        gih = jnp.dot(yx_v, w_ih, preferred_element_type=f32) + b_ih   # (P, 3*hid)

        h = jnp.zeros((N, hid), f32)
        h_list = []
        for t in range(T):                     # statically unrolled, T small
            g_i = gih[t * N:(t + 1) * N, :]                            # (N, 3*hid)
            g_h = jnp.dot(h, w_hh, preferred_element_type=f32) + b_hh
            rz = jax.nn.sigmoid(g_i[:, 0:2 * hid] + g_h[:, 0:2 * hid])  # fused r/z
            r_g = rz[:, 0:hid]
            z_g = rz[:, hid:2 * hid]
            n_g = jnp.tanh(g_i[:, 2 * hid:] + r_g * g_h[:, 2 * hid:])
            h = (1.0 - z_g) * n_g + z_g * h
            h_list.append(h)
        hs = jnp.concatenate(h_list, axis=0)                           # (P, hid) in vregs

        # ---------------- phase 2: batched heads + marginal likelihood -------
        fc = jnp.maximum(
            jnp.dot(hs, w_fc, preferred_element_type=f32) + b_fc, 0.0)  # (P, dense)
        heads = jnp.dot(fc, w_hd, preferred_element_type=f32) + b_hd
        mu_y = heads[:, 0:n_obs]                    # already H @ mu + mu_w (folded)
        var = _softplus(heads[:, n_obs:])

        r = y_v - mu_y                                                  # (P, n_obs)
        # A_p = H diag(var_p) H^T + Cw_{n(p)}, flattened on lanes: col = i*n_obs + j
        A = jnp.dot(var, hht, preferred_element_type=f32) + cw_v        # (P, nsq)

        lane = lax.broadcasted_iota(jnp.int32, (1, n_obs), 1)

        # ---- batched LDL^T forward elimination (A is SPD; no pivoting) ------
        # quad = r^T A^{-1} r = sum_k b_k^2 / d_k with b = L^{-1} r, d_k = pivots.
        b_vec = r
        quad = jnp.zeros((P, 1), f32)
        det = jnp.ones((P, 1), f32)
        for k in range(n_obs):
            rowk = A[:, k * n_obs:(k + 1) * n_obs]               # row k of each A_p
            pivot = rowk[:, k:k + 1]                             # (P, 1)
            inv_p = pl.reciprocal(pivot, approx=True)            # EUP vrcp
            det = det * pivot
            bk = b_vec[:, k:k + 1]                               # final at step k
            quad = quad + bk * bk * inv_p
            if k < n_obs - 1:                                    # no trailing block at last pivot
                fac = jnp.where(lane > k, rowk, 0.0) * inv_p     # multipliers (P, n_obs)
                b_vec = b_vec - fac * bk
                fac_exp = jnp.dot(fac, E, preferred_element_type=f32)  # fac[p,i] at col i*n+j
                rowk_til = jnp.tile(rowk, (1, n_obs))                  # rowk[p,j] at col i*n+j
                A = A - fac_exp * rowk_til
        logdet = jnp.log(det)                                    # single log after the loop

        # mean_n [ (-0.5*n_obs*T*log(2pi) - 0.5*sum_t(logdet+quad)) / (T*n_obs) ]
        total = jnp.sum(logdet + quad, keepdims=True)            # (1, 1)
        out_ref[...] = ((-0.5 * math.log(2.0 * math.pi))
                        - (0.5 / float(N * T * n_obs)) * total)

    out = pl.pallas_call(
        kernel,
        out_shape=jax.ShapeDtypeStruct((1, 1), jnp.float32),
    )(data, W_slab, b_slab, consts)
    return out[0, 0]


# ----------------------------------------------------------------------------
# Pure-JAX reference (mirrors the PyTorch forward semantics)
# ----------------------------------------------------------------------------
def idanse_forward_ref(Yi, Xhat, Cw, H, mu_w, params):
    N, T, n_obs = Yi.shape
    hid = params["W_hh"].shape[0]

    def rnn_single(y, xh):
        gih = y @ params["W_ih_y"] + xh @ params["W_ih_x"] + params["b_ih"][0]

        def step(h, g_i):
            g_h = h @ params["W_hh"] + params["b_hh"][0]
            r = jax.nn.sigmoid(g_i[:hid] + g_h[:hid])
            z = jax.nn.sigmoid(g_i[hid:2 * hid] + g_h[hid:2 * hid])
            n = jnp.tanh(g_i[2 * hid:] + r * g_h[2 * hid:])
            h_new = (1.0 - z) * n + z * h
            return h_new, h_new

        _, hs = lax.scan(step, jnp.zeros((hid,), jnp.float32), gih)
        fc = jnp.maximum(hs @ params["W_fc"] + params["b_fc"][0], 0.0)
        mu = fc @ params["W_mu"] + params["b_mu"][0]
        var = _softplus(fc @ params["W_var"] + params["b_var"][0])
        return mu, var

    mu, var = jax.vmap(rnn_single)(Yi, Xhat)                       # (N,T,n_states)
    mu_y = jnp.einsum('ij,ntj->nti', H, mu) + mu_w.reshape(-1)     # (N,T,n_obs)
    L_y = jnp.einsum('is,nts,js->ntij', H, var, H) + Cw[:, None, :, :]
    r = Yi - mu_y
    _, logdet = jnp.linalg.slogdet(L_y)
    sol = jnp.linalg.solve(L_y, r[..., None])[..., 0]
    quad = jnp.einsum('nti,nti->nt', r, sol)
    logprob = (-0.5 * n_obs * T * math.log(2.0 * math.pi)
               - 0.5 * logdet.sum(1) - 0.5 * quad.sum(1))
    return jnp.mean(logprob / (T * n_obs))


# ----------------------------------------------------------------------------
# Deterministic setup + run
# ----------------------------------------------------------------------------
if __name__ == "__main__":
    jax.config.update("jax_default_matmul_precision", "highest")

    N, T = 2, 8                 # batch, sequence length
    n_obs, n_states = 4, 4
    hidden, dense = 32, 32

    key = jax.random.PRNGKey(0)
    ks = jax.random.split(key, 20)

    Yi = jax.random.normal(ks[0], (N, T, n_obs), jnp.float32)
    Xhat = jax.random.normal(ks[1], (N, T, n_states), jnp.float32)
    A_cw = 0.2 * jax.random.normal(ks[2], (N, n_obs, n_obs), jnp.float32)
    Cw = jnp.einsum('nij,nkj->nik', A_cw, A_cw) + 0.5 * jnp.eye(n_obs, dtype=jnp.float32)[None]
    H = 0.5 * jax.random.normal(ks[3], (n_obs, n_states), jnp.float32)
    mu_w = 0.1 * jax.random.normal(ks[4], (n_obs, 1), jnp.float32)

    s = 0.3
    params = {
        "W_ih_y": s * jax.random.normal(ks[5], (n_obs, 3 * hidden), jnp.float32),
        "W_ih_x": s * jax.random.normal(ks[6], (n_states, 3 * hidden), jnp.float32),
        "b_ih": 0.1 * jax.random.normal(ks[7], (1, 3 * hidden), jnp.float32),
        "W_hh": (s / math.sqrt(hidden)) * jax.random.normal(ks[8], (hidden, 3 * hidden), jnp.float32),
        "b_hh": 0.1 * jax.random.normal(ks[9], (1, 3 * hidden), jnp.float32),
        "W_fc": (s / math.sqrt(hidden)) * jax.random.normal(ks[10], (hidden, dense), jnp.float32),
        "b_fc": 0.1 * jax.random.normal(ks[11], (1, dense), jnp.float32),
        "W_mu": (s / math.sqrt(dense)) * jax.random.normal(ks[12], (dense, n_states), jnp.float32),
        "b_mu": 0.1 * jax.random.normal(ks[13], (1, n_states), jnp.float32),
        "W_var": (s / math.sqrt(dense)) * jax.random.normal(ks[14], (dense, n_states), jnp.float32),
        "b_var": 0.1 * jax.random.normal(ks[15], (1, n_states), jnp.float32),
    }

    out_kernel = idanse_forward_pallas(Yi, Xhat, Cw, H, mu_w, params)
    out_kernel = jax.block_until_ready(out_kernel)

    out_ref = jax.block_until_ready(idanse_forward_ref(Yi, Xhat, Cw, H, mu_w, params))

    diff = abs(float(out_kernel) - float(out_ref))
    tol = 2e-2 + 2e-2 * abs(float(out_ref))
    assert diff <= tol, f"mismatch: kernel={float(out_kernel)} ref={float(out_ref)}"

    print("KERNEL_OK")
</pallas_src>

<mosaic_0001>
module attributes {stable_mosaic.version = 11 : i64} {
  func.func @kernel(%arg0: memref<16x28xf32, #tpu.memory_space<vmem>>, %arg1: memref<104x96xf32, #tpu.memory_space<vmem>>, %arg2: memref<4x96xf32, #tpu.memory_space<vmem>>, %arg3: memref<8x16xf32, #tpu.memory_space<vmem>>, %arg4: memref<1x1xf32, #tpu.memory_space<vmem>>) attributes {dimension_semantics = [], scalar_prefetch = 0 : i64, scratch_operands = 0 : i64, tpu.core_type = #tpu.core_type<tc>} {
    %c0 = arith.constant 0 : index
    %c0_0 = arith.constant 0 : index
    %0 = vector.load %arg0[%c0, %c0_0] : memref<16x28xf32, #tpu.memory_space<vmem>>, vector<16x28xf32>
    %1 = vector.extract_strided_slice %0 {offsets = [0, 0], sizes = [16, 8], strides = [1, 1]} : vector<16x28xf32> to vector<16x8xf32>
    %2 = vector.extract_strided_slice %0 {offsets = [0, 8], sizes = [16, 4], strides = [1, 1]} : vector<16x28xf32> to vector<16x4xf32>
    %3 = vector.extract_strided_slice %0 {offsets = [0, 12], sizes = [16, 16], strides = [1, 1]} : vector<16x28xf32> to vector<16x16xf32>
    %c0_1 = arith.constant 0 : index
    %c0_2 = arith.constant 0 : index
    %4 = vector.load %arg1[%c0_1, %c0_2] : memref<104x96xf32, #tpu.memory_space<vmem>>, vector<104x96xf32>
    %5 = vector.extract_strided_slice %4 {offsets = [0, 0], sizes = [8, 96], strides = [1, 1]} : vector<104x96xf32> to vector<8x96xf32>
    %6 = vector.extract_strided_slice %4 {offsets = [8, 0], sizes = [32, 96], strides = [1, 1]} : vector<104x96xf32> to vector<32x96xf32>
    %7 = vector.extract_strided_slice %4 {offsets = [40, 0], sizes = [32, 32], strides = [1, 1]} : vector<104x96xf32> to vector<32x32xf32>
    %8 = vector.extract_strided_slice %4 {offsets = [72, 0], sizes = [32, 8], strides = [1, 1]} : vector<104x96xf32> to vector<32x8xf32>
    %c0_3 = arith.constant 0 : index
    %c0_4 = arith.constant 0 : index
    %9 = vector.load %arg2[%c0_3, %c0_4] : memref<4x96xf32, #tpu.memory_space<vmem>>, vector<4x96xf32>
    %10 = vector.extract_strided_slice %9 {offsets = [0, 0], sizes = [1, 96], strides = [1, 1]} : vector<4x96xf32> to vector<1x96xf32>
    %11 = vector.extract_strided_slice %9 {offsets = [1, 0], sizes = [1, 96], strides = [1, 1]} : vector<4x96xf32> to vector<1x96xf32>
    %12 = vector.extract_strided_slice %9 {offsets = [2, 0], sizes = [1, 32], strides = [1, 1]} : vector<4x96xf32> to vector<1x32xf32>
    %13 = vector.extract_strided_slice %9 {offsets = [3, 0], sizes = [1, 8], strides = [1, 1]} : vector<4x96xf32> to vector<1x8xf32>
    %c0_5 = arith.constant 0 : index
    %c0_6 = arith.constant 0 : index
    %14 = vector.load %arg3[%c0_5, %c0_6] : memref<8x16xf32, #tpu.memory_space<vmem>>, vector<8x16xf32>
    %15 = vector.extract_strided_slice %14 {offsets = [0, 0], sizes = [4, 16], strides = [1, 1]} : vector<8x16xf32> to vector<4x16xf32>
    %16 = vector.extract_strided_slice %14 {offsets = [4, 0], sizes = [4, 16], strides = [1, 1]} : vector<8x16xf32> to vector<4x16xf32>
    %cst = arith.constant dense<0.000000e+00> : vector<16x96xf32>
    %17 = tpu.matmul %1, %5, %cst {dimension_numbers = #tpu.dot_dimension_numbers<[1], [0], [0], [1], [0, 0, 1, 1], [], []>, precision = #tpu.contract_precision<fp32>} : vector<16x8xf32>, vector<8x96xf32>, vector<16x96xf32> -> vector<16x96xf32>
    %18 = vector.broadcast %10 : vector<1x96xf32> to vector<16x96xf32>
    %19 = arith.addf %17, %18 : vector<16x96xf32>
    %cst_7 = arith.constant 0.000000e+00 : f32
    %20 = vector.broadcast %cst_7 : f32 to vector<2x32xf32>
    %21 = vector.extract_strided_slice %19 {offsets = [0, 0], sizes = [2, 96], strides = [1, 1]} : vector<16x96xf32> to vector<2x96xf32>
    %cst_8 = arith.constant dense<0.000000e+00> : vector<2x96xf32>
    %22 = tpu.matmul %20, %6, %cst_8 {dimension_numbers = #tpu.dot_dimension_numbers<[1], [0], [0], [1], [0, 0, 1, 1], [], []>, precision = #tpu.contract_precision<fp32>} : vector<2x32xf32>, vector<32x96xf32>, vector<2x96xf32> -> vector<2x96xf32>
    %23 = vector.broadcast %11 : vector<1x96xf32> to vector<2x96xf32>
    %24 = arith.addf %22, %23 : vector<2x96xf32>
    %25 = vector.extract_strided_slice %21 {offsets = [0, 0], sizes = [2, 64], strides = [1, 1]} : vector<2x96xf32> to vector<2x64xf32>
    %26 = vector.extract_strided_slice %24 {offsets = [0, 0], sizes = [2, 64], strides = [1, 1]} : vector<2x96xf32> to vector<2x64xf32>
    %27 = arith.addf %25, %26 : vector<2x64xf32>
    %28 = arith.negf %27 : vector<2x64xf32>
    %29 = math.exp %28 : vector<2x64xf32>
    %cst_9 = arith.constant 1.000000e+00 : f32
    %30 = vector.broadcast %cst_9 : f32 to vector<2x64xf32>
    %31 = arith.addf %30, %29 : vector<2x64xf32>
    %32 = arith.divf %30, %31 : vector<2x64xf32>
    %33 = vector.extract_strided_slice %32 {offsets = [0, 0], sizes = [2, 32], strides = [1, 1]} : vector<2x64xf32> to vector<2x32xf32>
    %34 = vector.extract_strided_slice %32 {offsets = [0, 32], sizes = [2, 32], strides = [1, 1]} : vector<2x64xf32> to vector<2x32xf32>
    %35 = vector.extract_strided_slice %21 {offsets = [0, 64], sizes = [2, 32], strides = [1, 1]} : vector<2x96xf32> to vector<2x32xf32>
    %36 = vector.extract_strided_slice %24 {offsets = [0, 64], sizes = [2, 32], strides = [1, 1]} : vector<2x96xf32> to vector<2x32xf32>
    %37 = arith.mulf %33, %36 : vector<2x32xf32>
    %38 = arith.addf %35, %37 : vector<2x32xf32>
    %39 = math.tanh %38 : vector<2x32xf32>
    %cst_10 = arith.constant 1.000000e+00 : f32
    %40 = vector.broadcast %cst_10 : f32 to vector<2x32xf32>
    %41 = arith.subf %40, %34 : vector<2x32xf32>
    %42 = arith.mulf %41, %39 : vector<2x32xf32>
    %43 = arith.mulf %34, %20 : vector<2x32xf32>
    %44 = arith.addf %42, %43 : vector<2x32xf32>
    %45 = vector.extract_strided_slice %19 {offsets = [2, 0], sizes = [2, 96], strides = [1, 1]} : vector<16x96xf32> to vector<2x96xf32>
    %cst_11 = arith.constant dense<0.000000e+00> : vector<2x96xf32>
    %46 = tpu.matmul %44, %6, %cst_11 {dimension_numbers = #tpu.dot_dimension_numbers<[1], [0], [0], [1], [0, 0, 1, 1], [], []>, precision = #tpu.contract_precision<fp32>} : vector<2x32xf32>, vector<32x96xf32>, vector<2x96xf32> -> vector<2x96xf32>
    %47 = vector.broadcast %11 : vector<1x96xf32> to vector<2x96xf32>
    %48 = arith.addf %46, %47 : vector<2x96xf32>
    %49 = vector.extract_strided_slice %45 {offsets = [0, 0], sizes = [2, 64], strides = [1, 1]} : vector<2x96xf32> to vector<2x64xf32>
    %50 = vector.extract_strided_slice %48 {offsets = [0, 0], sizes = [2, 64], strides = [1, 1]} : vector<2x96xf32> to vector<2x64xf32>
    %51 = arith.addf %49, %50 : vector<2x64xf32>
    %52 = arith.negf %51 : vector<2x64xf32>
    %53 = math.exp %52 : vector<2x64xf32>
    %cst_12 = arith.constant 1.000000e+00 : f32
    %54 = vector.broadcast %cst_12 : f32 to vector<2x64xf32>
    %55 = arith.addf %54, %53 : vector<2x64xf32>
    %56 = arith.divf %54, %55 : vector<2x64xf32>
    %57 = vector.extract_strided_slice %56 {offsets = [0, 0], sizes = [2, 32], strides = [1, 1]} : vector<2x64xf32> to vector<2x32xf32>
    %58 = vector.extract_strided_slice %56 {offsets = [0, 32], sizes = [2, 32], strides = [1, 1]} : vector<2x64xf32> to vector<2x32xf32>
    %59 = vector.extract_strided_slice %45 {offsets = [0, 64], sizes = [2, 32], strides = [1, 1]} : vector<2x96xf32> to vector<2x32xf32>
    %60 = vector.extract_strided_slice %48 {offsets = [0, 64], sizes = [2, 32], strides = [1, 1]} : vector<2x96xf32> to vector<2x32xf32>
    %61 = arith.mulf %57, %60 : vector<2x32xf32>
    %62 = arith.addf %59, %61 : vector<2x32xf32>
    %63 = math.tanh %62 : vector<2x32xf32>
    %cst_13 = arith.constant 1.000000e+00 : f32
    %64 = vector.broadcast %cst_13 : f32 to vector<2x32xf32>
    %65 = arith.subf %64, %58 : vector<2x32xf32>
    %66 = arith.mulf %65, %63 : vector<2x32xf32>
    %67 = arith.mulf %58, %44 : vector<2x32xf32>
    %68 = arith.addf %66, %67 : vector<2x32xf32>
    %69 = vector.extract_strided_slice %19 {offsets = [4, 0], sizes = [2, 96], strides = [1, 1]} : vector<16x96xf32> to vector<2x96xf32>
    %cst_14 = arith.constant dense<0.000000e+00> : vector<2x96xf32>
    %70 = tpu.matmul %68, %6, %cst_14 {dimension_numbers = #tpu.dot_dimension_numbers<[1], [0], [0], [1], [0, 0, 1, 1], [], []>, precision = #tpu.contract_precision<fp32>} : vector<2x32xf32>, vector<32x96xf32>, vector<2x96xf32> -> vector<2x96xf32>
    %71 = vector.broadcast %11 : vector<1x96xf32> to vector<2x96xf32>
    %72 = arith.addf %70, %71 : vector<2x96xf32>
    %73 = vector.extract_strided_slice %69 {offsets = [0, 0], sizes = [2, 64], strides = [1, 1]} : vector<2x96xf32> to vector<2x64xf32>
    %74 = vector.extract_strided_slice %72 {offsets = [0, 0], sizes = [2, 64], strides = [1, 1]} : vector<2x96xf32> to vector<2x64xf32>
    %75 = arith.addf %73, %74 : vector<2x64xf32>
    %76 = arith.negf %75 : vector<2x64xf32>
    %77 = math.exp %76 : vector<2x64xf32>
    %cst_15 = arith.constant 1.000000e+00 : f32
    %78 = vector.broadcast %cst_15 : f32 to vector<2x64xf32>
    %79 = arith.addf %78, %77 : vector<2x64xf32>
    %80 = arith.divf %78, %79 : vector<2x64xf32>
    %81 = vector.extract_strided_slice %80 {offsets = [0, 0], sizes = [2, 32], strides = [1, 1]} : vector<2x64xf32> to vector<2x32xf32>
    %82 = vector.extract_strided_slice %80 {offsets = [0, 32], sizes = [2, 32], strides = [1, 1]} : vector<2x64xf32> to vector<2x32xf32>
    %83 = vector.extract_strided_slice %69 {offsets = [0, 64], sizes = [2, 32], strides = [1, 1]} : vector<2x96xf32> to vector<2x32xf32>
    %84 = vector.extract_strided_slice %72 {offsets = [0, 64], sizes = [2, 32], strides = [1, 1]} : vector<2x96xf32> to vector<2x32xf32>
    %85 = arith.mulf %81, %84 : vector<2x32xf32>
    %86 = arith.addf %83, %85 : vector<2x32xf32>
    %87 = math.tanh %86 : vector<2x32xf32>
    %cst_16 = arith.constant 1.000000e+00 : f32
    %88 = vector.broadcast %cst_16 : f32 to vector<2x32xf32>
    %89 = arith.subf %88, %82 : vector<2x32xf32>
    %90 = arith.mulf %89, %87 : vector<2x32xf32>
    %91 = arith.mulf %82, %68 : vector<2x32xf32>
    %92 = arith.addf %90, %91 : vector<2x32xf32>
    %93 = vector.extract_strided_slice %19 {offsets = [6, 0], sizes = [2, 96], strides = [1, 1]} : vector<16x96xf32> to vector<2x96xf32>
    %cst_17 = arith.constant dense<0.000000e+00> : vector<2x96xf32>
    %94 = tpu.matmul %92, %6, %cst_17 {dimension_numbers = #tpu.dot_dimension_numbers<[1], [0], [0], [1], [0, 0, 1, 1], [], []>, precision = #tpu.contract_precision<fp32>} : vector<2x32xf32>, vector<32x96xf32>, vector<2x96xf32> -> vector<2x96xf32>
    %95 = vector.broadcast %11 : vector<1x96xf32> to vector<2x96xf32>
    %96 = arith.addf %94, %95 : vector<2x96xf32>
    %97 = vector.extract_strided_slice %93 {offsets = [0, 0], sizes = [2, 64], strides = [1, 1]} : vector<2x96xf32> to vector<2x64xf32>
    %98 = vector.extract_strided_slice %96 {offsets = [0, 0], sizes = [2, 64], strides = [1, 1]} : vector<2x96xf32> to vector<2x64xf32>
    %99 = arith.addf %97, %98 : vector<2x64xf32>
    %100 = arith.negf %99 : vector<2x64xf32>
    %101 = math.exp %100 : vector<2x64xf32>
    %cst_18 = arith.constant 1.000000e+00 : f32
    %102 = vector.broadcast %cst_18 : f32 to vector<2x64xf32>
    %103 = arith.addf %102, %101 : vector<2x64xf32>
    %104 = arith.divf %102, %103 : vector<2x64xf32>
    %105 = vector.extract_strided_slice %104 {offsets = [0, 0], sizes = [2, 32], strides = [1, 1]} : vector<2x64xf32> to vector<2x32xf32>
    %106 = vector.extract_strided_slice %104 {offsets = [0, 32], sizes = [2, 32], strides = [1, 1]} : vector<2x64xf32> to vector<2x32xf32>
    %107 = vector.extract_strided_slice %93 {offsets = [0, 64], sizes = [2, 32], strides = [1, 1]} : vector<2x96xf32> to vector<2x32xf32>
    %108 = vector.extract_strided_slice %96 {offsets = [0, 64], sizes = [2, 32], strides = [1, 1]} : vector<2x96xf32> to vector<2x32xf32>
    %109 = arith.mulf %105, %108 : vector<2x32xf32>
    %110 = arith.addf %107, %109 : vector<2x32xf32>
    %111 = math.tanh %110 : vector<2x32xf32>
    %cst_19 = arith.constant 1.000000e+00 : f32
    %112 = vector.broadcast %cst_19 : f32 to vector<2x32xf32>
    %113 = arith.subf %112, %106 : vector<2x32xf32>
    %114 = arith.mulf %113, %111 : vector<2x32xf32>
    %115 = arith.mulf %106, %92 : vector<2x32xf32>
    %116 = arith.addf %114, %115 : vector<2x32xf32>
    %117 = vector.extract_strided_slice %19 {offsets = [8, 0], sizes = [2, 96], strides = [1, 1]} : vector<16x96xf32> to vector<2x96xf32>
    %cst_20 = arith.constant dense<0.000000e+00> : vector<2x96xf32>
    %118 = tpu.matmul %116, %6, %cst_20 {dimension_numbers = #tpu.dot_dimension_numbers<[1], [0], [0], [1], [0, 0, 1, 1], [], []>, precision = #tpu.contract_precision<fp32>} : vector<2x32xf32>, vector<32x96xf32>, vector<2x96xf32> -> vector<2x96xf32>
    %119 = vector.broadcast %11 : vector<1x96xf32> to vector<2x96xf32>
    %120 = arith.addf %118, %119 : vector<2x96xf32>
    %121 = vector.extract_strided_slice %117 {offsets = [0, 0], sizes = [2, 64], strides = [1, 1]} : vector<2x96xf32> to vector<2x64xf32>
    %122 = vector.extract_strided_slice %120 {offsets = [0, 0], sizes = [2, 64], strides = [1, 1]} : vector<2x96xf32> to vector<2x64xf32>
    %123 = arith.addf %121, %122 : vector<2x64xf32>
    %124 = arith.negf %123 : vector<2x64xf32>
    %125 = math.exp %124 : vector<2x64xf32>
    %cst_21 = arith.constant 1.000000e+00 : f32
    %126 = vector.broadcast %cst_21 : f32 to vector<2x64xf32>
    %127 = arith.addf %126, %125 : vector<2x64xf32>
    %128 = arith.divf %126, %127 : vector<2x64xf32>
    %129 = vector.extract_strided_slice %128 {offsets = [0, 0], sizes = [2, 32], strides = [1, 1]} : vector<2x64xf32> to vector<2x32xf32>
    %130 = vector.extract_strided_slice %128 {offsets = [0, 32], sizes = [2, 32], strides = [1, 1]} : vector<2x64xf32> to vector<2x32xf32>
    %131 = vector.extract_strided_slice %117 {offsets = [0, 64], sizes = [2, 32], strides = [1, 1]} : vector<2x96xf32> to vector<2x32xf32>
    %132 = vector.extract_strided_slice %120 {offsets = [0, 64], sizes = [2, 32], strides = [1, 1]} : vector<2x96xf32> to vector<2x32xf32>
    %133 = arith.mulf %129, %132 : vector<2x32xf32>
    %134 = arith.addf %131, %133 : vector<2x32xf32>
    %135 = math.tanh %134 : vector<2x32xf32>
    %cst_22 = arith.constant 1.000000e+00 : f32
    %136 = vector.broadcast %cst_22 : f32 to vector<2x32xf32>
    %137 = arith.subf %136, %130 : vector<2x32xf32>
    %138 = arith.mulf %137, %135 : vector<2x32xf32>
    %139 = arith.mulf %130, %116 : vector<2x32xf32>
    %140 = arith.addf %138, %139 : vector<2x32xf32>
    %141 = vector.extract_strided_slice %19 {offsets = [10, 0], sizes = [2, 96], strides = [1, 1]} : vector<16x96xf32> to vector<2x96xf32>
    %cst_23 = arith.constant dense<0.000000e+00> : vector<2x96xf32>
    %142 = tpu.matmul %140, %6, %cst_23 {dimension_numbers = #tpu.dot_dimension_numbers<[1], [0], [0], [1], [0, 0, 1, 1], [], []>, precision = #tpu.contract_precision<fp32>} : vector<2x32xf32>, vector<32x96xf32>, vector<2x96xf32> -> vector<2x96xf32>
    %143 = vector.broadcast %11 : vector<1x96xf32> to vector<2x96xf32>
    %144 = arith.addf %142, %143 : vector<2x96xf32>
    %145 = vector.extract_strided_slice %141 {offsets = [0, 0], sizes = [2, 64], strides = [1, 1]} : vector<2x96xf32> to vector<2x64xf32>
    %146 = vector.extract_strided_slice %144 {offsets = [0, 0], sizes = [2, 64], strides = [1, 1]} : vector<2x96xf32> to vector<2x64xf32>
    %147 = arith.addf %145, %146 : vector<2x64xf32>
    %148 = arith.negf %147 : vector<2x64xf32>
    %149 = math.exp %148 : vector<2x64xf32>
    %cst_24 = arith.constant 1.000000e+00 : f32
    %150 = vector.broadcast %cst_24 : f32 to vector<2x64xf32>
    %151 = arith.addf %150, %149 : vector<2x64xf32>
    %152 = arith.divf %150, %151 : vector<2x64xf32>
    %153 = vector.extract_strided_slice %152 {offsets = [0, 0], sizes = [2, 32], strides = [1, 1]} : vector<2x64xf32> to vector<2x32xf32>
    %154 = vector.extract_strided_slice %152 {offsets = [0, 32], sizes = [2, 32], strides = [1, 1]} : vector<2x64xf32> to vector<2x32xf32>
    %155 = vector.extract_strided_slice %141 {offsets = [0, 64], sizes = [2, 32], strides = [1, 1]} : vector<2x96xf32> to vector<2x32xf32>
    %156 = vector.extract_strided_slice %144 {offsets = [0, 64], sizes = [2, 32], strides = [1, 1]} : vector<2x96xf32> to vector<2x32xf32>
    %157 = arith.mulf %153, %156 : vector<2x32xf32>
    %158 = arith.addf %155, %157 : vector<2x32xf32>
    %159 = math.tanh %158 : vector<2x32xf32>
    %cst_25 = arith.constant 1.000000e+00 : f32
    %160 = vector.broadcast %cst_25 : f32 to vector<2x32xf32>
    %161 = arith.subf %160, %154 : vector<2x32xf32>
    %162 = arith.mulf %161, %159 : vector<2x32xf32>
    %163 = arith.mulf %154, %140 : vector<2x32xf32>
    %164 = arith.addf %162, %163 : vector<2x32xf32>
    %165 = vector.extract_strided_slice %19 {offsets = [12, 0], sizes = [2, 96], strides = [1, 1]} : vector<16x96xf32> to vector<2x96xf32>
    %cst_26 = arith.constant dense<0.000000e+00> : vector<2x96xf32>
    %166 = tpu.matmul %164, %6, %cst_26 {dimension_numbers = #tpu.dot_dimension_numbers<[1], [0], [0], [1], [0, 0, 1, 1], [], []>, precision = #tpu.contract_precision<fp32>} : vector<2x32xf32>, vector<32x96xf32>, vector<2x96xf32> -> vector<2x96xf32>
    %167 = vector.broadcast %11 : vector<1x96xf32> to vector<2x96xf32>
    %168 = arith.addf %166, %167 : vector<2x96xf32>
    %169 = vector.extract_strided_slice %165 {offsets = [0, 0], sizes = [2, 64], strides = [1, 1]} : vector<2x96xf32> to vector<2x64xf32>
    %170 = vector.extract_strided_slice %168 {offsets = [0, 0], sizes = [2, 64], strides = [1, 1]} : vector<2x96xf32> to vector<2x64xf32>
    %171 = arith.addf %169, %170 : vector<2x64xf32>
    %172 = arith.negf %171 : vector<2x64xf32>
    %173 = math.exp %172 : vector<2x64xf32>
    %cst_27 = arith.constant 1.000000e+00 : f32
    %174 = vector.broadcast %cst_27 : f32 to vector<2x64xf32>
    %175 = arith.addf %174, %173 : vector<2x64xf32>
    %176 = arith.divf %174, %175 : vector<2x64xf32>
    %177 = vector.extract_strided_slice %176 {offsets = [0, 0], sizes = [2, 32], strides = [1, 1]} : vector<2x64xf32> to vector<2x32xf32>
    %178 = vector.extract_strided_slice %176 {offsets = [0, 32], sizes = [2, 32], strides = [1, 1]} : vector<2x64xf32> to vector<2x32xf32>
    %179 = vector.extract_strided_slice %165 {offsets = [0, 64], sizes = [2, 32], strides = [1, 1]} : vector<2x96xf32> to vector<2x32xf32>
    %180 = vector.extract_strided_slice %168 {offsets = [0, 64], sizes = [2, 32], strides = [1, 1]} : vector<2x96xf32> to vector<2x32xf32>
    %181 = arith.mulf %177, %180 : vector<2x32xf32>
    %182 = arith.addf %179, %181 : vector<2x32xf32>
    %183 = math.tanh %182 : vector<2x32xf32>
    %cst_28 = arith.constant 1.000000e+00 : f32
    %184 = vector.broadcast %cst_28 : f32 to vector<2x32xf32>
    %185 = arith.subf %184, %178 : vector<2x32xf32>
    %186 = arith.mulf %185, %183 : vector<2x32xf32>
    %187 = arith.mulf %178, %164 : vector<2x32xf32>
    %188 = arith.addf %186, %187 : vector<2x32xf32>
    %189 = vector.extract_strided_slice %19 {offsets = [14, 0], sizes = [2, 96], strides = [1, 1]} : vector<16x96xf32> to vector<2x96xf32>
    %cst_29 = arith.constant dense<0.000000e+00> : vector<2x96xf32>
    %190 = tpu.matmul %188, %6, %cst_29 {dimension_numbers = #tpu.dot_dimension_numbers<[1], [0], [0], [1], [0, 0, 1, 1], [], []>, precision = #tpu.contract_precision<fp32>} : vector<2x32xf32>, vector<32x96xf32>, vector<2x96xf32> -> vector<2x96xf32>
    %191 = vector.broadcast %11 : vector<1x96xf32> to vector<2x96xf32>
    %192 = arith.addf %190, %191 : vector<2x96xf32>
    %193 = vector.extract_strided_slice %189 {offsets = [0, 0], sizes = [2, 64], strides = [1, 1]} : vector<2x96xf32> to vector<2x64xf32>
    %194 = vector.extract_strided_slice %192 {offsets = [0, 0], sizes = [2, 64], strides = [1, 1]} : vector<2x96xf32> to vector<2x64xf32>
    %195 = arith.addf %193, %194 : vector<2x64xf32>
    %196 = arith.negf %195 : vector<2x64xf32>
    %197 = math.exp %196 : vector<2x64xf32>
    %cst_30 = arith.constant 1.000000e+00 : f32
    %198 = vector.broadcast %cst_30 : f32 to vector<2x64xf32>
    %199 = arith.addf %198, %197 : vector<2x64xf32>
    %200 = arith.divf %198, %199 : vector<2x64xf32>
    %201 = vector.extract_strided_slice %200 {offsets = [0, 0], sizes = [2, 32], strides = [1, 1]} : vector<2x64xf32> to vector<2x32xf32>
    %202 = vector.extract_strided_slice %200 {offsets = [0, 32], sizes = [2, 32], strides = [1, 1]} : vector<2x64xf32> to vector<2x32xf32>
    %203 = vector.extract_strided_slice %189 {offsets = [0, 64], sizes = [2, 32], strides = [1, 1]} : vector<2x96xf32> to vector<2x32xf32>
    %204 = vector.extract_strided_slice %192 {offsets = [0, 64], sizes = [2, 32], strides = [1, 1]} : vector<2x96xf32> to vector<2x32xf32>
    %205 = arith.mulf %201, %204 : vector<2x32xf32>
    %206 = arith.addf %203, %205 : vector<2x32xf32>
    %207 = math.tanh %206 : vector<2x32xf32>
    %cst_31 = arith.constant 1.000000e+00 : f32
    %208 = vector.broadcast %cst_31 : f32 to vector<2x32xf32>
    %209 = arith.subf %208, %202 : vector<2x32xf32>
    %210 = arith.mulf %209, %207 : vector<2x32xf32>
    %211 = arith.mulf %202, %188 : vector<2x32xf32>
    %212 = arith.addf %210, %211 : vector<2x32xf32>
    %213 = tpu.concatenate %44, %68, %92, %116, %140, %164, %188, %212 in 0 : vector<2x32xf32>, vector<2x32xf32>, vector<2x32xf32>, vector<2x32xf32>, vector<2x32xf32>, vector<2x32xf32>, vector<2x32xf32>, vector<2x32xf32> -> vector<16x32xf32>
    %cst_32 = arith.constant dense<0.000000e+00> : vector<16x32xf32>
    %214 = tpu.matmul %213, %7, %cst_32 {dimension_numbers = #tpu.dot_dimension_numbers<[1], [0], [0], [1], [0, 0, 1, 1], [], []>, precision = #tpu.contract_precision<fp32>} : vector<16x32xf32>, vector<32x32xf32>, vector<16x32xf32> -> vector<16x32xf32>
    %215 = vector.broadcast %12 : vector<1x32xf32> to vector<16x32xf32>
    %216 = arith.addf %214, %215 : vector<16x32xf32>
    %cst_33 = arith.constant 0.000000e+00 : f32
    %217 = vector.broadcast %cst_33 : f32 to vector<16x32xf32>
    %218 = arith.maximumf %216, %217 : vector<16x32xf32>
    %cst_34 = arith.constant dense<0.000000e+00> : vector<16x8xf32>
    %219 = tpu.matmul %218, %8, %cst_34 {dimension_numbers = #tpu.dot_dimension_numbers<[1], [0], [0], [1], [0, 0, 1, 1], [], []>, precision = #tpu.contract_precision<fp32>} : vector<16x32xf32>, vector<32x8xf32>, vector<16x8xf32> -> vector<16x8xf32>
    %220 = vector.broadcast %13 : vector<1x8xf32> to vector<16x8xf32>
    %221 = arith.addf %219, %220 : vector<16x8xf32>
    %222 = vector.extract_strided_slice %221 {offsets = [0, 0], sizes = [16, 4], strides = [1, 1]} : vector<16x8xf32> to vector<16x4xf32>
    %223 = vector.extract_strided_slice %221 {offsets = [0, 4], sizes = [16, 4], strides = [1, 1]} : vector<16x8xf32> to vector<16x4xf32>
    %cst_35 = arith.constant 0.000000e+00 : f32
    %224 = vector.broadcast %cst_35 : f32 to vector<16x4xf32>
    %225 = arith.maximumf %223, %224 : vector<16x4xf32>
    %226 = math.absf %223 : vector<16x4xf32>
    %cst_36 = arith.constant 0.000000e+00 : f32
    %227 = vector.broadcast %cst_36 : f32 to vector<16x4xf32>
    %228 = arith.subf %227, %226 : vector<16x4xf32>
    %229 = math.exp %228 : vector<16x4xf32>
    %cst_37 = arith.constant 1.000000e+00 : f32
    %230 = vector.broadcast %cst_37 : f32 to vector<16x4xf32>
    %231 = arith.addf %230, %229 : vector<16x4xf32>
    %232 = math.log %231 : vector<16x4xf32>
    %233 = arith.addf %225, %232 : vector<16x4xf32>
    %234 = arith.subf %2, %222 : vector<16x4xf32>
    %cst_38 = arith.constant dense<0.000000e+00> : vector<16x16xf32>
    %235 = tpu.matmul %233, %15, %cst_38 {dimension_numbers = #tpu.dot_dimension_numbers<[1], [0], [0], [1], [0, 0, 1, 1], [], []>, precision = #tpu.contract_precision<fp32>} : vector<16x4xf32>, vector<4x16xf32>, vector<16x16xf32> -> vector<16x16xf32>
    %236 = arith.addf %235, %3 : vector<16x16xf32>
    %237 = tpu.iota {dimensions = array<i32: 1>} : vector<1x4xi32>
    %cst_39 = arith.constant 0.000000e+00 : f32
    %238 = vector.broadcast %cst_39 : f32 to vector<16x1xf32>
    %cst_40 = arith.constant 1.000000e+00 : f32
    %239 = vector.broadcast %cst_40 : f32 to vector<16x1xf32>
    %240 = vector.extract_strided_slice %236 {offsets = [0, 0], sizes = [16, 4], strides = [1, 1]} : vector<16x16xf32> to vector<16x4xf32>
    %241 = vector.extract_strided_slice %240 {offsets = [0, 0], sizes = [16, 1], strides = [1, 1]} : vector<16x4xf32> to vector<16x1xf32>
    %242 = tpu.reciprocal %241 {approx = true} : vector<16x1xf32> -> vector<16x1xf32>
    %243 = arith.mulf %239, %241 : vector<16x1xf32>
    %244 = vector.extract_strided_slice %234 {offsets = [0, 0], sizes = [16, 1], strides = [1, 1]} : vector<16x4xf32> to vector<16x1xf32>
    %245 = arith.mulf %244, %244 : vector<16x1xf32>
    %246 = arith.mulf %245, %242 : vector<16x1xf32>
    %247 = arith.addf %238, %246 : vector<16x1xf32>
    %c0_i32 = arith.constant 0 : i32
    %248 = vector.broadcast %c0_i32 : i32 to vector<1x4xi32>
    %249 = arith.cmpi sgt, %237, %248 : vector<1x4xi32>
    %cst_41 = arith.constant 0.000000e+00 : f32
    %250 = vector.shape_cast %249 : vector<1x4xi1> to vector<1x4xi1>
    %251 = vector.broadcast %250 : vector<1x4xi1> to vector<16x4xi1>
    %252 = vector.broadcast %cst_41 : f32 to vector<16x4xf32>
    %253 = arith.select %251, %240, %252 : vector<16x4xi1>, vector<16x4xf32>
    %254 = vector.broadcast %242 : vector<16x1xf32> to vector<16x4xf32>
    %255 = arith.mulf %253, %254 : vector<16x4xf32>
    %256 = vector.broadcast %244 : vector<16x1xf32> to vector<16x4xf32>
    %257 = arith.mulf %255, %256 : vector<16x4xf32>
    %258 = arith.subf %234, %257 : vector<16x4xf32>
    %cst_42 = arith.constant dense<0.000000e+00> : vector<16x16xf32>
    %259 = tpu.matmul %255, %16, %cst_42 {dimension_numbers = #tpu.dot_dimension_numbers<[1], [0], [0], [1], [0, 0, 1, 1], [], []>, precision = #tpu.contract_precision<fp32>} : vector<16x4xf32>, vector<4x16xf32>, vector<16x16xf32> -> vector<16x16xf32>
    %260 = tpu.concatenate %240, %240, %240, %240 in 1 : vector<16x4xf32>, vector<16x4xf32>, vector<16x4xf32>, vector<16x4xf32> -> vector<16x16xf32>
    %261 = arith.mulf %259, %260 : vector<16x16xf32>
    %262 = arith.subf %236, %261 : vector<16x16xf32>
    %263 = vector.extract_strided_slice %262 {offsets = [0, 4], sizes = [16, 4], strides = [1, 1]} : vector<16x16xf32> to vector<16x4xf32>
    %264 = vector.extract_strided_slice %263 {offsets = [0, 1], sizes = [16, 1], strides = [1, 1]} : vector<16x4xf32> to vector<16x1xf32>
    %265 = tpu.reciprocal %264 {approx = true} : vector<16x1xf32> -> vector<16x1xf32>
    %266 = arith.mulf %243, %264 : vector<16x1xf32>
    %267 = vector.extract_strided_slice %258 {offsets = [0, 1], sizes = [16, 1], strides = [1, 1]} : vector<16x4xf32> to vector<16x1xf32>
    %268 = arith.mulf %267, %267 : vector<16x1xf32>
    %269 = arith.mulf %268, %265 : vector<16x1xf32>
    %270 = arith.addf %247, %269 : vector<16x1xf32>
    %c1_i32 = arith.constant 1 : i32
    %271 = vector.broadcast %c1_i32 : i32 to vector<1x4xi32>
    %272 = arith.cmpi sgt, %237, %271 : vector<1x4xi32>
    %cst_43 = arith.constant 0.000000e+00 : f32
    %273 = vector.shape_cast %272 : vector<1x4xi1> to vector<1x4xi1>
    %274 = vector.broadcast %273 : vector<1x4xi1> to vector<16x4xi1>
    %275 = vector.broadcast %cst_43 : f32 to vector<16x4xf32>
    %276 = arith.select %274, %263, %275 : vector<16x4xi1>, vector<16x4xf32>
    %277 = vector.broadcast %265 : vector<16x1xf32> to vector<16x4xf32>
    %278 = arith.mulf %276, %277 : vector<16x4xf32>
    %279 = vector.broadcast %267 : vector<16x1xf32> to vector<16x4xf32>
    %280 = arith.mulf %278, %279 : vector<16x4xf32>
    %281 = arith.subf %258, %280 : vector<16x4xf32>
    %cst_44 = arith.constant dense<0.000000e+00> : vector<16x16xf32>
    %282 = tpu.matmul %278, %16, %cst_44 {dimension_numbers = #tpu.dot_dimension_numbers<[1], [0], [0], [1], [0, 0, 1, 1], [], []>, precision = #tpu.contract_precision<fp32>} : vector<16x4xf32>, vector<4x16xf32>, vector<16x16xf32> -> vector<16x16xf32>
    %283 = tpu.concatenate %263, %263, %263, %263 in 1 : vector<16x4xf32>, vector<16x4xf32>, vector<16x4xf32>, vector<16x4xf32> -> vector<16x16xf32>
    %284 = arith.mulf %282, %283 : vector<16x16xf32>
    %285 = arith.subf %262, %284 : vector<16x16xf32>
    %286 = vector.extract_strided_slice %285 {offsets = [0, 8], sizes = [16, 4], strides = [1, 1]} : vector<16x16xf32> to vector<16x4xf32>
    %287 = vector.extract_strided_slice %286 {offsets = [0, 2], sizes = [16, 1], strides = [1, 1]} : vector<16x4xf32> to vector<16x1xf32>
    %288 = tpu.reciprocal %287 {approx = true} : vector<16x1xf32> -> vector<16x1xf32>
    %289 = arith.mulf %266, %287 : vector<16x1xf32>
    %290 = vector.extract_strided_slice %281 {offsets = [0, 2], sizes = [16, 1], strides = [1, 1]} : vector<16x4xf32> to vector<16x1xf32>
    %291 = arith.mulf %290, %290 : vector<16x1xf32>
    %292 = arith.mulf %291, %288 : vector<16x1xf32>
    %293 = arith.addf %270, %292 : vector<16x1xf32>
    %c2_i32 = arith.constant 2 : i32
    %294 = vector.broadcast %c2_i32 : i32 to vector<1x4xi32>
    %295 = arith.cmpi sgt, %237, %294 : vector<1x4xi32>
    %cst_45 = arith.constant 0.000000e+00 : f32
    %296 = vector.shape_cast %295 : vector<1x4xi1> to vector<1x4xi1>
    %297 = vector.broadcast %296 : vector<1x4xi1> to vector<16x4xi1>
    %298 = vector.broadcast %cst_45 : f32 to vector<16x4xf32>
    %299 = arith.select %297, %286, %298 : vector<16x4xi1>, vector<16x4xf32>
    %300 = vector.broadcast %288 : vector<16x1xf32> to vector<16x4xf32>
    %301 = arith.mulf %299, %300 : vector<16x4xf32>
    %302 = vector.broadcast %290 : vector<16x1xf32> to vector<16x4xf32>
    %303 = arith.mulf %301, %302 : vector<16x4xf32>
    %304 = arith.subf %281, %303 : vector<16x4xf32>
    %cst_46 = arith.constant dense<0.000000e+00> : vector<16x16xf32>
    %305 = tpu.matmul %301, %16, %cst_46 {dimension_numbers = #tpu.dot_dimension_numbers<[1], [0], [0], [1], [0, 0, 1, 1], [], []>, precision = #tpu.contract_precision<fp32>} : vector<16x4xf32>, vector<4x16xf32>, vector<16x16xf32> -> vector<16x16xf32>
    %306 = tpu.concatenate %286, %286, %286, %286 in 1 : vector<16x4xf32>, vector<16x4xf32>, vector<16x4xf32>, vector<16x4xf32> -> vector<16x16xf32>
    %307 = arith.mulf %305, %306 : vector<16x16xf32>
    %308 = arith.subf %285, %307 : vector<16x16xf32>
    %309 = vector.extract_strided_slice %308 {offsets = [0, 12], sizes = [16, 4], strides = [1, 1]} : vector<16x16xf32> to vector<16x4xf32>
    %310 = vector.extract_strided_slice %309 {offsets = [0, 3], sizes = [16, 1], strides = [1, 1]} : vector<16x4xf32> to vector<16x1xf32>
    %311 = tpu.reciprocal %310 {approx = true} : vector<16x1xf32> -> vector<16x1xf32>
    %312 = arith.mulf %289, %310 : vector<16x1xf32>
    %313 = vector.extract_strided_slice %304 {offsets = [0, 3], sizes = [16, 1], strides = [1, 1]} : vector<16x4xf32> to vector<16x1xf32>
    %314 = arith.mulf %313, %313 : vector<16x1xf32>
    %315 = arith.mulf %314, %311 : vector<16x1xf32>
    %316 = arith.addf %293, %315 : vector<16x1xf32>
    %317 = math.log %312 : vector<16x1xf32>
    %318 = arith.addf %317, %316 : vector<16x1xf32>
    %319 = vector.shape_cast %318 : vector<16x1xf32> to vector<1x16x1xf32>
    %cst_47 = arith.constant dense<0.000000e+00> : vector<1xf32>
    %320 = vector.multi_reduction <add>, %319, %cst_47 [1, 2] : vector<1x16x1xf32> to vector<1xf32>
    %321 = vector.shape_cast %320 : vector<1xf32> to vector<1x1x1xf32>
    %322 = vector.extract %321[0, 0, 0] : f32 from vector<1x1x1xf32>
    %323 = vector.broadcast %322 : f32 to vector<1x1xf32>
    %cst_48 = arith.constant 7.812500e-03 : f32
    %324 = vector.broadcast %cst_48 : f32 to vector<1x1xf32>
    %325 = arith.mulf %324, %323 : vector<1x1xf32>
    %cst_49 = arith.constant -0.918938517 : f32
    %326 = vector.broadcast %cst_49 : f32 to vector<1x1xf32>
    %327 = arith.subf %326, %325 : vector<1x1xf32>
    %c0_50 = arith.constant 0 : index
    %c0_51 = arith.constant 0 : index
    %328 = vector.load %arg4[%c0_50, %c0_51] : memref<1x1xf32, #tpu.memory_space<vmem>>, vector<1x1xf32>
    tpu.vector_store %arg4[%c0_50, %c0_51], %327 {strides = array<i32>} : memref<1x1xf32, #tpu.memory_space<vmem>>, vector<1x1xf32>,
    return
  }
}

</mosaic_0001>

<bundles_post_ra>
// kernel: tpu_custom_call.1
= control target key start
LH: loop header
LB: loop body
LE: loop exit
PB: predicated region body
PF: predicated region fallthrough
CT: control target
= control target key end

     0   :  { %vm36_vm0 = vcmask 64512   ;;  %s4612_s0 = inlined_call_operand.vmem [shape: f32[16,28], index: 0, kind: input, shape index: {}]   ;;  %s4613_s1 = inlined_call_operand.vmem [shape: f32[104,96], index: 1, kind: input, shape index: {}]   ;;  %s4614_s2 = inlined_call_operand.vmem [shape: f32[4,96], index: 2, kind: input, shape index: {}]   ;;  %s4615_s3 = inlined_call_operand.vmem [shape: f32[8,16], index: 3, kind: input, shape index: {}]   ;;  %s4616_s4 = inlined_call_operand.hbm [shape: f32[1,1], index: 4, kind: output, shape index: {}]  }
   0x1   :  { %v20_v0 = vld [vmem:[%s4613_s1] sm:$0xff]  ;;  %v19_v6 = vld [vmem:[%s4612_s0 + $0x8] sm:$0xff]  ;;  %v23_v7 = vld [vmem:[%s4613_s1 + $0x18] sm:$0xff] }
   0x2   :  { %v18_v1 = vld [vmem:[%s4612_s0] sm:$0xff]  ;;  %v58_v3 = vand.u32 4294901760, %v20_v0  ;;  %v22_v8 = vld [vmem:[%s4613_s1 + $0x10] sm:$0xff]  ;;  %v41_v10 = vsel %vm36_vm0, %v19_v6, 0  ;;  %v3898_v11 = vand.u32 4294901760, %v23_v7  ;;  %v21_v13 = vld [vmem:[%s4613_s1 + $0x8] sm:$0xff] }
   0x3   :  { %v24_v2 = vld [vmem:[%s4613_s1 + $0x20] sm:$0xff]  ;;  %v38_v4 = vsel %vm36_vm0, %v18_v1, 0  ;;  %v3900_v12 = vand.u32 4294901760, %v22_v8  ;;  %v3908_v16 = vand.u32 4294901760, %v41_v10  ;;  %v3910_v17 = vand.u32 4294901760, %v21_v13 }
   0x4   :  { %v3884_v5 = vand.u32 4294901760, %v24_v2  ;;  %v3895_v9 = vand.u32 4294901760, %v38_v4  ;;  %v93_v14 = vsub.f32 %v20_v0, %v58_v3  ;;  %152 = vmatpush.msra.mxu3 %v58_v3  ;;  %59 = vmatpush.msra.mxu0 %v58_v3 }
   0x6   :  { %v3906_v15 = vsub.f32 %v24_v2, %v3884_v5 }
   0x7   :  { %9 = vsyncpa [#allocation3], 0  ;;  %v61_v18 = vsub.f32 %v38_v4, %v3895_v9  ;;  %v3914_v19 = vsub.f32 %v23_v7, %v3898_v11  ;;  %v3917_v20 = vsub.f32 %v22_v8, %v3900_v12  ;;  %124 = vmatpush.msra.mxu2 %v93_v14  ;;  %v94_v21 = vand.u32 4294901760, %v93_v14  ;;  %v4024_v53 = vld [vmem:[%s4614_s2] sm:$0xf]  ;;  %s3829_s5 = smov 64  }
   0x8   :  { %v3920_v22 = vand.u32 4294901760, %v3906_v15  ;;  %v69_v23 = vsub.f32 %v41_v10, %v3908_v16  ;;  %v3924_v24 = vsub.f32 %v21_v13, %v3910_v17  ;;  %v3828_v44 = vmov 0.0   ;;  %s3830_s6 = smov 96   ;;  %s3832_s27 = smov 116  }
   0x9   :  { %127 = vmatmul.f32.vlgmr.msra.gmra.mxu2 %v61_v18  ;;  %v62_v25 = vand.u32 4294901760, %v61_v18  ;;  %v3927_v26 = vand.u32 4294901760, %v3914_v19  ;;  %v3930_v27 = vand.u32 4294901760, %v3917_v20  ;;  %184 = vmatpush.msrb.mxu0 %v94_v21  ;;  %v95_v29 = vsub.f32 %v93_v14, %v94_v21  ;;  %s3835_s30 = smov 8   ;;  %s3842_s7 = smov 126  }
   0xa   :  { %238 = vmatpush.msrb.mxu2 %v3884_v5  ;;  %v269_v28 = vsub.f32 %v3906_v15, %v3920_v22  ;;  %v3936_v30 = vand.u32 4294901760, %v3924_v24  ;;  %v70_v32 = vand.u32 4294901760, %v69_v23  ;;  %v4027_v54 = vperm.slane %v4024_v53, 1  ;;  %s3843_s8 = smov 127   ;;  %s3844_s9 = smov 123  }
   0xb   :  { %156 = vmatmul.f32.vlgmr.msra.gmra.mxu3 %v62_v25  ;;  %v63_v31 = vsub.f32 %v61_v18, %v62_v25  ;;  %v275_v33 = vsub.f32 %v3914_v19, %v3927_v26  ;;  %v281_v34 = vsub.f32 %v3917_v20, %v3930_v27  ;;  %v96_v36 = vand.u32 4294901760, %v95_v29  ;;  %s3845_s10 = smov 118   ;;  %s3846_s11 = smov 125  }
   0xc   :  { %v3942_v35 = vand.u32 4294901760, %v269_v28  ;;  %240 = vmatpush.msrb.mxu2 %v3898_v11  ;;  %v287_v37 = vsub.f32 %v3924_v24, %v3936_v30  ;;  %v71_v41 = vsub.f32 %v69_v23, %v70_v32  ;;  %v35_v8 = vperm.slane %v4024_v53, 0  ;;  %s3847_s12 = smov 113   ;;  %s3848_s14 = smov [#allocation2]  }
   0xd   :  { %v64_v38 = vand.u32 4294901760, %v63_v31  ;;  %v3947_v39 = vand.u32 4294901760, %v275_v33  ;;  %97 = vmatpush.msra.mxu1 %v96_v36  ;;  %v3950_v40 = vand.u32 4294901760, %v281_v34  ;;  %vm221_vm5 = vcmask 261120   ;;  %s3669_s15 = sshll.u32 %s3848_s14, 4  ;;  %s3671_s18 = sshll.u32 %s4616_s4, 4  ;;  %s3670_s15 = int_to_ptr.vmem [resolvable:$true] %s3669_s15  ;;  %s3672_s18 = int_to_ptr.hbm [resolvable:$true] %s3671_s18 }
   0xe   :  { %271 = vmatpush.msrb.mxu3 %v3942_v35  ;;  %99 = vmatmul.f32.vlgmr.msra.gmra.mxu1 %v3895_v9  ;;  %v3954_v42 = vand.u32 4294901760, %v287_v37  ;;  %v72_v43 = vand.u32 4294901760, %v71_v41  ;;  %vm2082_vm14 = vcmask 1041408   ;;  %vm2084_vm15 = vcmask 1043456  }
   0xf   :  { %65 = vmatmul.f32.vlgmr.msra.gmra.mxu0 %v64_v38  ;;  %210 = vmatpush.msrb.mxu1 %v58_v3 }
  0x10   :  { %277 = vmatpush.msrb.mxu3 %v3947_v39  ;;  %367 = vmatpush.msra.mxu0 %v3920_v22 }
  0x11   :  { %132 = vmatmul.f32.gmra.mxu2 %v69_v23  ;;  %398 = vmatpush.msra.mxu1 %v3884_v5 }
  0x12   :  { %242 = vmatpush.msrb.mxu2 %v3900_v12  ;;  %283 = vmatpush.msrb.mxu3 %v3950_v40 }
  0x13   :  { %162 = vmatmul.f32.gmra.mxu3 %v70_v32  ;;  %371 = vmatpush.msra.mxu0 %v3927_v26 }
  0x14   :  { %244 = vmatpush.msrb.mxu2 %v3910_v17  ;;  %289 = vmatpush.msrb.mxu3 %v3954_v42 }
  0x15   :  { %400 = vmatpush.msra.mxu1 %v3898_v11  ;;  %375 = vmatpush.msra.mxu0 %v3930_v27 }
  0x16   :  { %309 = vmatpush.msra.mxu2 %v3906_v15  ;;  %338 = vmatpush.msra.mxu3 %v3884_v5 }
  0x17   :  { %73 = vmatmul.f32.gmra.mxu0 %v72_v43  ;;  %103 = vmatmul.f32.gmra.mxu1 %v3908_v16 }
  0x18   :  { %312 = vmatpush.msra.mxu2 %v3914_v19  ;;  %340 = vmatpush.msra.mxu3 %v3898_v11 }
  0x19   :  { %250 = vmatmul.f32.vlgmr.msrb.gmra.mxu2 %v3828_v44  ;;  %402 = vmatpush.msra.mxu1 %v3900_v12 }
  0x1a   :  { %315 = vmatpush.msra.mxu2 %v3917_v20  ;;  %342 = vmatpush.msra.mxu3 %v3900_v12 }
  0x1b   :  { %291 = vmatmul.f32.vlgmr.msrb.gmra.mxu3 %v3828_v44  ;;  %379 = vmatpush.msra.mxu0 %v3936_v30 }
  0x1c   :  { %318 = vmatpush.msra.mxu2 %v3924_v24  ;;  %344 = vmatpush.msra.mxu3 %v3910_v17 }
  0x1d   :  { %404 = vmatpush.msra.mxu1 %v3910_v17 }
  0x1e   :  { %500 = vmatpush.msrb.mxu3 %v3942_v35  ;;  %467 = vmatpush.msrb.mxu2 %v3884_v5 }
  0x1f   :  { %186 = vmatmul.f32.vlgmr.msrb.gmra.mxu0 %v3895_v9  ;;  %212 = vmatmul.f32.vlgmr.msrb.gmra.mxu1 %v3895_v9 }
  0x20   :  { %506 = vmatpush.msrb.mxu3 %v3947_v39  ;;  %538 = vmatpush.msrb.mxu0 %v3906_v15 }
  0x21   :  { %321 = vmatmul.f32.vlgmr.msra.gmra.mxu2 %v3828_v44  ;;  %567 = vmatpush.msrb.mxu1 %v3884_v5 }
  0x22   :  { %512 = vmatpush.msrb.mxu3 %v3950_v40  ;;  %541 = vmatpush.msrb.mxu0 %v3914_v19 }
  0x23   :  { %348 = vmatmul.f32.vlgmr.msra.gmra.mxu3 %v3828_v44  ;;  %569 = vmatpush.msrb.mxu1 %v3898_v11 }
  0x24   :  { %518 = vmatpush.msrb.mxu3 %v3954_v42  ;;  %544 = vmatpush.msrb.mxu0 %v3917_v20 }
  0x25   :  { %571 = vmatpush.msrb.mxu1 %v3900_v12  ;;  %469 = vmatpush.msrb.mxu2 %v3898_v11 }
  0x26   :  { %627 = vmatpush.msra.mxu3 %v3884_v5  ;;  %547 = vmatpush.msrb.mxu0 %v3924_v24 }
  0x27   :  { %190 = vmatmul.f32.gmra.mxu0 %v3908_v16  ;;  %216 = vmatmul.f32.gmra.mxu1 %v3908_v16 }
  0x28   :  { %573 = vmatpush.msrb.mxu1 %v3910_v17  ;;  %629 = vmatpush.msra.mxu3 %v3898_v11 }
  0x29   :  { %471 = vmatpush.msrb.mxu2 %v3900_v12 }
  0x2a   :  { %631 = vmatpush.msra.mxu3 %v3900_v12 }
  0x2b   :  { %473 = vmatpush.msrb.mxu2 %v3910_v17 }
  0x2c   :  { %633 = vmatpush.msra.mxu3 %v3910_v17 }
  0x2d   :  { %596 = vmatpush.msra.mxu2 %v3920_v22 }
  0x2f   :  { %600 = vmatpush.msra.mxu2 %v3927_v26  ;;  %381 = vmatmul.f32.vlgmr.msra.gmra.mxu0 %v3828_v44 }
  0x30   :  { %406 = vmatmul.f32.vlgmr.msra.gmra.mxu1 %v3828_v44  ;;  %701 = vmatpush.msra.mxu0 %v3884_v5 }
  0x31   :  { %604 = vmatpush.msra.mxu2 %v3930_v27  ;;  %734 = vmatpush.msra.mxu1 %v3942_v35 }
  0x32   :  { %703 = vmatpush.msra.mxu0 %v3898_v11 }
  0x33   :  { %608 = vmatpush.msra.mxu2 %v3936_v30  ;;  %740 = vmatpush.msra.mxu1 %v3947_v39 }
  0x34   :  { %705 = vmatpush.msra.mxu0 %v3900_v12 }
  0x35   :  { %746 = vmatpush.msra.mxu1 %v3950_v40 }
  0x36   :  { %707 = vmatpush.msra.mxu0 %v3910_v17 }
  0x37   :  { %752 = vmatpush.msra.mxu1 %v3954_v42 }
  0x8b   :  { %v100_v47 = vpop.f32.mrf.mxu1 }
  0x8c   :  { %v66_v45 = vpop.f32.mrf.mxu0  ;;  %v128_v46 = vpop.f32.mrf.mxu2 }
  0x8d   :  { %v67_v9 = vadd.f32 %v66_v45, %v35_v8 }
  0x8e   :  { %v157_v48 = vpop.f32.mrf.mxu3 }
  0x8f   :  { %v101_v10 = vadd.f32 %v100_v47, %v67_v9 }
  0x91   :  { %v129_v13 = vadd.f32 %v128_v46, %v101_v10 }
  0x93   :  { %v158_v14 = vadd.f32 %v157_v48, %v129_v13 }
  0x94   :  { %v4013_v49 = vpop.f32.mrf.mxu0  ;;  %v4015_v50 = vpop.f32.mrf.mxu2 }
  0x95   :  { %v4017_v51 = vpop.f32.mrf.mxu1 }
  0x96   :  { %v4019_v52 = vpop.f32.mrf.mxu3 }
  0x9c   :  { %v187_v55 = vpop.f32.mrf.mxu0  ;;  %v251_v56 = vpop.f32.mrf.mxu2 }
  0x9d   :  { %v213_v57 = vpop.f32.mrf.mxu1  ;;  %v252_v59 = vadd.f32 %v251_v56, %v4027_v54  ;;  %v188_v16 = vadd.f32 %v187_v55, %v158_v14 }
  0x9e   :  { %v292_v58 = vpop.f32.mrf.mxu3 }
  0x9f   :  { %v293_v60 = vadd.f32 %v292_v58, %v252_v59  ;;  %v4038_v18 = vadd.f32 %v213_v57, %v188_v16 }
  0xa4   :  { %v4030_v61 = vpop.f32.mrf.mxu0  ;;  %v322_v62 = vpop.f32.mrf.mxu2 }
  0xa5   :  { %v4032_v63 = vpop.f32.mrf.mxu1  ;;  %v323_v0 = vadd.f32 %v322_v62, %v293_v60 }
  0xa6   :  { %v349_v1 = vpop.f32.mrf.mxu3 }
  0xa7   :  { %v350_v2 = vadd.f32 %v349_v1, %v323_v0 }
  0xac   :  { %v382_v3 = vpop.f32.mrf.mxu0 }
  0xad   :  { %v383_v4 = vadd.f32 %v382_v3, %v350_v2  ;;  %v407_v6 = vpop.f32.mrf.mxu1 }
  0xaf   :  { %v408_v7 = vadd.f32 %v407_v6, %v383_v4 }
  0xb1   :  { %431 = vrot.lane.b32.xlu0 %v408_v7, %s3829_s5  ;;  %v410_v21 = vadd.f32 %v408_v7, %v4038_v18 }
  0xb3   :  { %v3680_v23 = vmul.f32 -1.442695, %v410_v21 }
  0xb5   :  { %3723 = vpow2.f32 %v3680_v23 }
  0xbb   :  { %v3724_v25 = vpop.eup %3723 }
  0xbc   :  { %v414_v28 = vadd.f32 1.0, %v3724_v25 }
  0xbe   :  { %3725 = vrcp.f32 %v414_v28  ;;  %v426_v36 = vand.u32 2147483648, %v414_v28  ;;  %vm420_vm2 = vweird.f32 %v414_v28  ;;  %v424_v37 = vand.u32 2147483647, %v414_v28 }
  0xc0   :  { %v427_v41 = vor.u32 1.1754944e-38, %v426_v36  ;;  %vm425_vm4 = vcmp.eq.f32.partialorder %v424_v37, 8.507059e+37 }
  0xc4   :  { %v3726_v29 = vpop.eup %3725 }
  0xc5   :  { %v416_v31 = vmul.f32 %v3726_v29, %v414_v28  ;;  %vm421_vm1 = vweird.f32 %v3726_v29 }
  0xc6   :  { %vm422_vm3 = vmor %vm420_vm2, %vm421_vm1 }
  0xc7   :  { %v417_v32 = vsub.f32 1.0, %v416_v31 }
  0xc9   :  { %v418_v33 = vmul.f32 %v3726_v29, %v417_v32 }
  0xcb   :  { %v419_v34 = vadd.f32 %v3726_v29, %v418_v33 }
  0xcd   :  { %v423_v38 = vsel %vm422_vm3, %v3726_v29, %v419_v34 }
  0xce   :  { %v428_v44 = vsel %vm425_vm4, %v427_v41, %v423_v38 }
  0xcf   :  { %v441_v55 = vsub.f32 1.0, %v428_v44  ;;  %v447_v57 = vmul.f32 0.0, %v428_v44 }
 0x123   :  { %v432_v43 = vpop.permute.xlu0 %431 }
 0x124   :  { %v434_v45 = vmul.f32 %v432_v43, %v428_v44 }
 0x126   :  { %436 = vrot.lane.b32.xlu0 %v434_v45, %s3829_s5 }
 0x198   :  { %v437_v46 = vpop.permute.xlu0 %436 }
 0x199   :  { %v439_v47 = vadd.f32 %v437_v46, %v4038_v18 }
 0x19b   :  { %3727 = vtanh.f32 %v439_v47 }
 0x1a1   :  { %v3728_v48 = vpop.eup %3727 }
 0x1a2   :  { %443 = vrot.lane.b32.xlu1 %v3728_v48, %s3830_s6 }
 0x214   :  { %v444_v56 = vpop.permute.xlu1 %443 }
 0x215   :  { %v446_v58 = vmul.f32 %v444_v56, %v441_v55 }
 0x217   :  { %v4044_v59 = vadd.f32 %v447_v57, %v446_v58 }
 0x219   :  { %450 = vrot.lane.b32.xlu1 %v4044_v59, %s3830_s6 }
 0x28b   :  { %v451_v60 = vpop.permute.xlu1 %450 }
 0x28c   :  { %v452_v62 = vsel %vm221_vm5, %v451_v60, 0 }
 0x28d   :  { %v474_v0 = vand.u32 4294901760, %v452_v62 }
 0x28f   :  { %v475_v1 = vsub.f32 %v452_v62, %v474_v0  ;;  %520 = vmatmul.f32.vlgmr.msrb.gmra.mxu3 %v474_v0 }
 0x290   :  { %801 = vmatpush.msrb.mxu3 %v3884_v5 }
 0x291   :  { %v476_v2 = vand.u32 4294901760, %v475_v1  ;;  %550 = vmatmul.f32.vlgmr.msrb.gmra.mxu0 %v475_v1 }
 0x292   :  { %803 = vmatpush.msrb.mxu3 %v3898_v11  ;;  %830 = vmatpush.msrb.mxu0 %v3920_v22 }
 0x293   :  { %v477_v3 = vsub.f32 %v475_v1, %v476_v2  ;;  %577 = vmatmul.f32.vlgmr.msrb.gmra.mxu1 %v476_v2  ;;  %v678_v1 = vrot.slane %v4044_v59, 6 }
 0x294   :  { %805 = vmatpush.msrb.mxu3 %v3900_v12  ;;  %861 = vmatpush.msrb.mxu1 %v3884_v5 }
 0x295   :  { %v478_v4 = vand.u32 4294901760, %v477_v3  ;;  %834 = vmatpush.msrb.mxu0 %v3927_v26 }
 0x296   :  { %807 = vmatpush.msrb.mxu3 %v3910_v17  ;;  %863 = vmatpush.msrb.mxu1 %v3898_v11 }
 0x297   :  { %479 = vmatmul.f32.vlgmr.msrb.gmra.mxu2 %v478_v4  ;;  %635 = vmatmul.f32.vlgmr.msra.gmra.mxu3 %v474_v0 }
 0x298   :  { %772 = vmatpush.msrb.mxu2 %v3906_v15  ;;  %865 = vmatpush.msrb.mxu1 %v3900_v12 }
 0x299   :  { %838 = vmatpush.msrb.mxu0 %v3930_v27  ;;  %968 = vmatpush.msra.mxu3 %v3942_v35 }
 0x29a   :  { %775 = vmatpush.msrb.mxu2 %v3914_v19  ;;  %867 = vmatpush.msrb.mxu1 %v3910_v17 }
 0x29b   :  { %842 = vmatpush.msrb.mxu0 %v3936_v30  ;;  %974 = vmatpush.msra.mxu3 %v3947_v39 }
 0x29c   :  { %778 = vmatpush.msrb.mxu2 %v3917_v20 }
 0x29d   :  { %980 = vmatpush.msra.mxu3 %v3950_v40 }
 0x29e   :  { %781 = vmatpush.msrb.mxu2 %v3924_v24 }
 0x29f   :  { %610 = vmatmul.f32.vlgmr.msra.gmra.mxu2 %v474_v0  ;;  %986 = vmatpush.msra.mxu3 %v3954_v42 }
 0x2a0   :  { %935 = vmatpush.msra.mxu2 %v3884_v5 }
 0x2a2   :  { %937 = vmatpush.msra.mxu2 %v3898_v11 }
 0x2a4   :  { %939 = vmatpush.msra.mxu2 %v3900_v12 }
 0x2a6   :  { %941 = vmatpush.msra.mxu2 %v3910_v17 }
 0x30e   :  { %v551_v13 = vpop.f32.mrf.mxu0 }
 0x310   :  { %v578_v16 = vpop.f32.mrf.mxu1 }
 0x312   :  { %v521_v6 = vpop.f32.mrf.mxu3 }
 0x31a   :  { %v480_v7 = vpop.f32.mrf.mxu2  ;;  %v636_v28 = vpop.f32.mrf.mxu3 }
 0x31b   :  { %v481_v9 = vadd.f32 %v480_v7, %v4027_v54 }
 0x31d   :  { %v522_v10 = vadd.f32 %v521_v6, %v481_v9 }
 0x31f   :  { %v552_v14 = vadd.f32 %v551_v13, %v522_v10 }
 0x321   :  { %v579_v21 = vadd.f32 %v578_v16, %v552_v14 }
 0x322   :  { %v611_v23 = vpop.f32.mrf.mxu2 }
 0x323   :  { %v612_v25 = vadd.f32 %v611_v23, %v579_v21 }
 0x325   :  { %v637_v29 = vadd.f32 %v636_v28, %v612_v25 }
 0x327   :  { %v640_v31 = vrot.slane %v637_v29, 6 }
 0x329   :  { %662 = vrot.lane.b32.xlu2 %v640_v31, %s3829_s5  ;;  %v642_v32 = vadd.f32 %v640_v31, %v4038_v18 }
 0x32b   :  { %v3681_v33 = vmul.f32 -1.442695, %v642_v32 }
 0x32d   :  { %3729 = vpow2.f32 %v3681_v33 }
 0x333   :  { %v3730_v34 = vpop.eup %3729 }
 0x334   :  { %v646_v36 = vadd.f32 1.0, %v3730_v34 }
 0x336   :  { %3731 = vrcp.f32 %v646_v36  ;;  %v658_v45 = vand.u32 2147483648, %v646_v36  ;;  %vm652_vm7 = vweird.f32 %v646_v36  ;;  %v656_v46 = vand.u32 2147483647, %v646_v36 }
 0x338   :  { %v659_v48 = vor.u32 1.1754944e-38, %v658_v45  ;;  %vm657_vm9 = vcmp.eq.f32.partialorder %v656_v46, 8.507059e+37 }
 0x33c   :  { %v3732_v37 = vpop.eup %3731 }
 0x33d   :  { %v648_v38 = vmul.f32 %v3732_v37, %v646_v36  ;;  %vm653_vm6 = vweird.f32 %v3732_v37 }
 0x33e   :  { %vm654_vm8 = vmor %vm652_vm7, %vm653_vm6  ;;  %vm2086_vm6 = vcmask 1045504  }
 0x33f   :  { %v649_v41 = vsub.f32 1.0, %v648_v38 }
 0x341   :  { %v650_v43 = vmul.f32 %v3732_v37, %v649_v41 }
 0x343   :  { %v651_v44 = vadd.f32 %v3732_v37, %v650_v43 }
 0x345   :  { %v655_v47 = vsel %vm654_vm8, %v3732_v37, %v651_v44 }
 0x346   :  { %v660_v56 = vsel %vm657_vm9, %v659_v48, %v655_v47 }
 0x347   :  { %v672_v0 = vsub.f32 1.0, %v660_v56  ;;  %v680_v4 = vmul.f32 %v678_v1, %v660_v56 }
 0x383   :  { %v663_v55 = vpop.permute.xlu2 %662 }
 0x384   :  { %v665_v57 = vmul.f32 %v663_v55, %v660_v56 }
 0x386   :  { %667 = vrot.lane.b32.xlu2 %v665_v57, %s3829_s5 }
 0x3e0   :  { %v668_v58 = vpop.permute.xlu2 %667 }
 0x3e1   :  { %v670_v60 = vadd.f32 %v668_v58, %v4038_v18 }
 0x3e3   :  { %3733 = vtanh.f32 %v670_v60 }
 0x3e9   :  { %v3734_v62 = vpop.eup %3733 }
 0x3ea   :  { %674 = vrot.lane.b32.xlu0 %v3734_v62, %s3830_s6 }
 0x45c   :  { %v675_v2 = vpop.permute.xlu0 %674 }
 0x45d   :  { %v677_v3 = vmul.f32 %v675_v2, %v672_v0 }
 0x45f   :  { %v4080_v6 = vadd.f32 %v680_v4, %v677_v3 }
 0x461   :  { %v683_v7 = vrot.slane %v4080_v6, 2  ;;  %v912_v3 = vrot.slane %v4080_v6, 6 }
 0x463   :  { %684 = vrot.lane.b32.xlu1 %v683_v7, %s3830_s6 }
 0x4d5   :  { %v685_v9 = vpop.permute.xlu1 %684 }
 0x4d6   :  { %v686_v10 = vsel %vm221_vm5, %v685_v9, 0 }
 0x4d7   :  { %v708_v13 = vand.u32 4294901760, %v686_v10 }
 0x4d9   :  { %v709_v14 = vsub.f32 %v686_v10, %v708_v13  ;;  %754 = vmatmul.f32.vlgmr.msra.gmra.mxu1 %v708_v13 }
 0x4da   :  { %1035 = vmatpush.msra.mxu1 %v3884_v5 }
 0x4db   :  { %v710_v16 = vand.u32 4294901760, %v709_v14  ;;  %784 = vmatmul.f32.vlgmr.msrb.gmra.mxu2 %v709_v14 }
 0x4dc   :  { %1037 = vmatpush.msra.mxu1 %v3898_v11  ;;  %1064 = vmatpush.msrb.mxu2 %v3920_v22 }
 0x4dd   :  { %v711_v21 = vsub.f32 %v709_v14, %v710_v16  ;;  %811 = vmatmul.f32.vlgmr.msrb.gmra.mxu3 %v710_v16 }
 0x4de   :  { %1039 = vmatpush.msra.mxu1 %v3900_v12  ;;  %1095 = vmatpush.msrb.mxu3 %v3884_v5 }
 0x4df   :  { %v712_v23 = vand.u32 4294901760, %v711_v21  ;;  %1068 = vmatpush.msrb.mxu2 %v3927_v26 }
 0x4e0   :  { %1041 = vmatpush.msra.mxu1 %v3910_v17  ;;  %1097 = vmatpush.msrb.mxu3 %v3898_v11 }
 0x4e1   :  { %713 = vmatmul.f32.vlgmr.msra.gmra.mxu0 %v712_v23  ;;  %869 = vmatmul.f32.vlgmr.msrb.gmra.mxu1 %v708_v13 }
 0x4e2   :  { %1006 = vmatpush.msra.mxu0 %v3906_v15  ;;  %1099 = vmatpush.msrb.mxu3 %v3900_v12 }
 0x4e3   :  { %1072 = vmatpush.msrb.mxu2 %v3930_v27  ;;  %1202 = vmatpush.msrb.mxu1 %v3942_v35 }
 0x4e4   :  { %1009 = vmatpush.msra.mxu0 %v3914_v19  ;;  %1101 = vmatpush.msrb.mxu3 %v3910_v17 }
 0x4e5   :  { %1076 = vmatpush.msrb.mxu2 %v3936_v30  ;;  %1208 = vmatpush.msrb.mxu1 %v3947_v39 }
 0x4e6   :  { %1012 = vmatpush.msra.mxu0 %v3917_v20 }
 0x4e7   :  { %1214 = vmatpush.msrb.mxu1 %v3950_v40 }
 0x4e8   :  { %1015 = vmatpush.msra.mxu0 %v3924_v24 }
 0x4e9   :  { %844 = vmatmul.f32.vlgmr.msrb.gmra.mxu0 %v708_v13  ;;  %1220 = vmatpush.msrb.mxu1 %v3954_v42 }
 0x4ea   :  { %1169 = vmatpush.msrb.mxu0 %v3884_v5 }
 0x4ec   :  { %1171 = vmatpush.msrb.mxu0 %v3898_v11 }
 0x4ee   :  { %1173 = vmatpush.msrb.mxu0 %v3900_v12 }
 0x4f0   :  { %1175 = vmatpush.msrb.mxu0 %v3910_v17 }
 0x556   :  { %v755_v25 = vpop.f32.mrf.mxu1 }
 0x55e   :  { %v714_v28 = vpop.f32.mrf.mxu0  ;;  %v785_v32 = vpop.f32.mrf.mxu2 }
 0x55f   :  { %v715_v29 = vadd.f32 %v714_v28, %v4027_v54  ;;  %v870_v41 = vpop.f32.mrf.mxu1 }
 0x560   :  { %v812_v34 = vpop.f32.mrf.mxu3 }
 0x561   :  { %v756_v31 = vadd.f32 %v755_v25, %v715_v29  ;;  %v2083_v29 = vsel %vm2082_vm14, %v4044_v59, %v4080_v6 }
 0x563   :  { %v786_v33 = vadd.f32 %v785_v32, %v756_v31 }
 0x565   :  { %v813_v36 = vadd.f32 %v812_v34, %v786_v33 }
 0x566   :  { %v845_v37 = vpop.f32.mrf.mxu0 }
 0x567   :  { %v846_v38 = vadd.f32 %v845_v37, %v813_v36 }
 0x569   :  { %v871_v43 = vadd.f32 %v870_v41, %v846_v38 }
 0x56b   :  { %v874_v44 = vrot.slane %v871_v43, 4 }
 0x56d   :  { %896 = vrot.lane.b32.xlu2 %v874_v44, %s3829_s5  ;;  %v876_v45 = vadd.f32 %v874_v44, %v4038_v18 }
 0x56f   :  { %v3682_v46 = vmul.f32 -1.442695, %v876_v45 }
 0x571   :  { %3735 = vpow2.f32 %v3682_v46 }
 0x577   :  { %v3736_v47 = vpop.eup %3735 }
 0x578   :  { %v880_v48 = vadd.f32 1.0, %v3736_v47 }
 0x57a   :  { %3737 = vrcp.f32 %v880_v48  ;;  %v892_v58 = vand.u32 2147483648, %v880_v48  ;;  %v890_v62 = vand.u32 2147483647, %v880_v48  ;;  %vm886_vm11 = vweird.f32 %v880_v48 }
 0x57c   :  { %v893_v1 = vor.u32 1.1754944e-38, %v892_v58  ;;  %vm891_vm13 = vcmp.eq.f32.partialorder %v890_v62, 8.507059e+37 }
 0x580   :  { %v3738_v55 = vpop.eup %3737 }
 0x581   :  { %v882_v56 = vmul.f32 %v3738_v55, %v880_v48  ;;  %vm887_vm10 = vweird.f32 %v3738_v55 }
 0x582   :  { %vm888_vm12 = vmor %vm886_vm11, %vm887_vm10 }
 0x583   :  { %v883_v57 = vsub.f32 1.0, %v882_v56 }
 0x585   :  { %v884_v60 = vmul.f32 %v3738_v55, %v883_v57 }
 0x587   :  { %v885_v0 = vadd.f32 %v3738_v55, %v884_v60 }
 0x589   :  { %v889_v2 = vsel %vm888_vm12, %v3738_v55, %v885_v0 }
 0x58a   :  { %v894_v4 = vsel %vm891_vm13, %v893_v1, %v889_v2 }
 0x58b   :  { %v914_v7 = vmul.f32 %v912_v3, %v894_v4  ;;  %v906_v21 = vsub.f32 1.0, %v894_v4 }
 0x5c7   :  { %v897_v9 = vpop.permute.xlu2 %896 }
 0x5c8   :  { %v899_v10 = vmul.f32 %v897_v9, %v894_v4 }
 0x5ca   :  { %901 = vrot.lane.b32.xlu0 %v899_v10, %s3829_s5 }
 0x63c   :  { %v902_v13 = vpop.permute.xlu0 %901 }
 0x63d   :  { %v904_v14 = vadd.f32 %v902_v13, %v4038_v18 }
 0x63f   :  { %3739 = vtanh.f32 %v904_v14 }
 0x645   :  { %v3740_v16 = vpop.eup %3739 }
 0x646   :  { %908 = vrot.lane.b32.xlu1 %v3740_v16, %s3830_s6 }
 0x6b8   :  { %v909_v23 = vpop.permute.xlu1 %908 }
 0x6b9   :  { %v911_v25 = vmul.f32 %v909_v23, %v906_v21 }
 0x6bb   :  { %v4116_v28 = vadd.f32 %v914_v7, %v911_v25 }
 0x6bd   :  { %v917_v31 = vrot.slane %v4116_v28, 4  ;;  %v4124_v32 = vsel %vm2084_vm15, %v2083_v29, %v4116_v28 }
 0x6bf   :  { %918 = vrot.lane.b32.xlu2 %v917_v31, %s3830_s6 }
 0x719   :  { %v919_v33 = vpop.permute.xlu2 %918 }
 0x71a   :  { %v920_v34 = vsel %vm221_vm5, %v919_v33, 0 }
 0x71b   :  { %v942_v36 = vand.u32 4294901760, %v920_v34 }
 0x71d   :  { %v943_v37 = vsub.f32 %v920_v34, %v942_v36  ;;  %988 = vmatmul.f32.vlgmr.msra.gmra.mxu3 %v942_v36 }
 0x71e   :  { %1269 = vmatpush.msra.mxu3 %v3884_v5 }
 0x71f   :  { %v944_v38 = vand.u32 4294901760, %v943_v37  ;;  %1018 = vmatmul.f32.vlgmr.msra.gmra.mxu0 %v943_v37 }
 0x720   :  { %1271 = vmatpush.msra.mxu3 %v3898_v11  ;;  %1298 = vmatpush.msra.mxu0 %v3920_v22 }
 0x721   :  { %v945_v59 = vsub.f32 %v943_v37, %v944_v38  ;;  %1045 = vmatmul.f32.vlgmr.msra.gmra.mxu1 %v944_v38  ;;  %v1146_v38 = vrot.slane %v4116_v28, 6 }
 0x722   :  { %1273 = vmatpush.msra.mxu3 %v3900_v12  ;;  %1329 = vmatpush.msra.mxu1 %v3884_v5 }
 0x723   :  { %v946_v6 = vand.u32 4294901760, %v945_v59  ;;  %1302 = vmatpush.msra.mxu0 %v3927_v26 }
 0x724   :  { %1275 = vmatpush.msra.mxu3 %v3910_v17  ;;  %1331 = vmatpush.msra.mxu1 %v3898_v11 }
 0x725   :  { %947 = vmatmul.f32.vlgmr.msra.gmra.mxu2 %v946_v6  ;;  %1103 = vmatmul.f32.vlgmr.msrb.gmra.mxu3 %v942_v36 }
 0x726   :  { %1240 = vmatpush.msra.mxu2 %v3906_v15  ;;  %1333 = vmatpush.msra.mxu1 %v3900_v12 }
 0x727   :  { %1306 = vmatpush.msra.mxu0 %v3930_v27  ;;  %1432 = vmatpush.msrb.mxu3 %v3942_v35 }
 0x728   :  { %1243 = vmatpush.msra.mxu2 %v3914_v19  ;;  %1335 = vmatpush.msra.mxu1 %v3910_v17 }
 0x729   :  { %1310 = vmatpush.msra.mxu0 %v3936_v30  ;;  %1438 = vmatpush.msrb.mxu3 %v3947_v39 }
 0x72a   :  { %1246 = vmatpush.msra.mxu2 %v3917_v20 }
 0x72b   :  { %1444 = vmatpush.msrb.mxu3 %v3950_v40 }
 0x72c   :  { %1249 = vmatpush.msra.mxu2 %v3924_v24 }
 0x72d   :  { %1078 = vmatmul.f32.vlgmr.msrb.gmra.mxu2 %v942_v36  ;;  %1450 = vmatpush.msrb.mxu3 %v3954_v42 }
 0x72e   :  { %1399 = vmatpush.msrb.mxu2 %v3884_v5 }
 0x730   :  { %1401 = vmatpush.msrb.mxu2 %v3898_v11 }
 0x732   :  { %1403 = vmatpush.msrb.mxu2 %v3900_v12 }
 0x734   :  { %1405 = vmatpush.msrb.mxu2 %v3910_v17 }
 0x79c   :  { %v1019_v46 = vpop.f32.mrf.mxu0 }
 0x79e   :  { %v1046_v48 = vpop.f32.mrf.mxu1 }
 0x7a0   :  { %v989_v41 = vpop.f32.mrf.mxu3 }
 0x7a8   :  { %v948_v43 = vpop.f32.mrf.mxu2  ;;  %v1104_v58 = vpop.f32.mrf.mxu3 }
 0x7a9   :  { %v949_v44 = vadd.f32 %v948_v43, %v4027_v54 }
 0x7ab   :  { %v990_v45 = vadd.f32 %v989_v41, %v949_v44 }
 0x7ad   :  { %v1020_v47 = vadd.f32 %v1019_v46, %v990_v45 }
 0x7af   :  { %v1047_v55 = vadd.f32 %v1046_v48, %v1020_v47 }
 0x7b0   :  { %v1079_v56 = vpop.f32.mrf.mxu2 }
 0x7b1   :  { %v1080_v57 = vadd.f32 %v1079_v56, %v1047_v55 }
 0x7b3   :  { %v1105_v60 = vadd.f32 %v1104_v58, %v1080_v57 }
 0x7b5   :  { %v1108_v62 = vrot.slane %v1105_v60, 2 }
 0x7b7   :  { %1130 = vrot.lane.b32.xlu0 %v1108_v62, %s3829_s5  ;;  %v1110_v0 = vadd.f32 %v1108_v62, %v4038_v18 }
 0x7b9   :  { %v3683_v1 = vmul.f32 -1.442695, %v1110_v0 }
 0x7bb   :  { %3741 = vpow2.f32 %v3683_v1 }
 0x7c1   :  { %v3742_v2 = vpop.eup %3741 }
 0x7c2   :  { %v1114_v3 = vadd.f32 1.0, %v3742_v2 }
 0x7c4   :  { %3743 = vrcp.f32 %v1114_v3  ;;  %v1126_v14 = vand.u32 2147483648, %v1114_v3  ;;  %vm1120_vm2 = vweird.f32 %v1114_v3  ;;  %v1124_v16 = vand.u32 2147483647, %v1114_v3 }
 0x7c6   :  { %v1127_v23 = vor.u32 1.1754944e-38, %v1126_v14  ;;  %vm1125_vm4 = vcmp.eq.f32.partialorder %v1124_v16, 8.507059e+37 }
 0x7ca   :  { %v3744_v4 = vpop.eup %3743 }
 0x7cb   :  { %v1116_v7 = vmul.f32 %v3744_v4, %v1114_v3  ;;  %vm1121_vm1 = vweird.f32 %v3744_v4 }
 0x7cc   :  { %vm1122_vm3 = vmor %vm1120_vm2, %vm1121_vm1 }
 0x7cd   :  { %v1117_v9 = vsub.f32 1.0, %v1116_v7 }
 0x7cf   :  { %v1118_v10 = vmul.f32 %v3744_v4, %v1117_v9 }
 0x7d1   :  { %v1119_v13 = vadd.f32 %v3744_v4, %v1118_v10  ;;  %v75_v10 = vadd.f32 %v4013_v49, %v35_v8 }
 0x7d3   :  { %v1123_v21 = vsel %vm1122_vm3, %v3744_v4, %v1119_v13  ;;  %v105_v13 = vadd.f32 %v4017_v51, %v75_v10 }
 0x7d4   :  { %v1128_v29 = vsel %vm1125_vm4, %v1127_v23, %v1123_v21 }
 0x7d5   :  { %v1140_v37 = vsub.f32 1.0, %v1128_v29  ;;  %v1148_v6 = vmul.f32 %v1146_v38, %v1128_v29  ;;  %v134_v14 = vadd.f32 %v4015_v50, %v105_v13 }
 0x7d7   :  { %v164_v16 = vadd.f32 %v4019_v52, %v134_v14 }
 0x7d9   :  { %v192_v21 = vadd.f32 %v4030_v61, %v164_v16 }
 0x7db   :  { %v4205_v23 = vadd.f32 %v4032_v63, %v192_v21 }
 0x829   :  { %v1131_v25 = vpop.permute.xlu0 %1130 }
 0x82a   :  { %v1133_v31 = vmul.f32 %v1131_v25, %v1128_v29 }
 0x82c   :  { %1135 = vrot.lane.b32.xlu1 %v1133_v31, %s3829_s5 }
 0x89e   :  { %v1136_v33 = vpop.permute.xlu1 %1135 }
 0x89f   :  { %v1138_v34 = vadd.f32 %v1136_v33, %v4038_v18 }
 0x8a1   :  { %3745 = vtanh.f32 %v1138_v34 }
 0x8a7   :  { %v3746_v36 = vpop.eup %3745 }
 0x8a8   :  { %1142 = vrot.lane.b32.xlu2 %v3746_v36, %s3830_s6 }
 0x902   :  { %v1143_v59 = vpop.permute.xlu2 %1142 }
 0x903   :  { %v1145_v41 = vmul.f32 %v1143_v59, %v1140_v37 }
 0x905   :  { %v4159_v43 = vadd.f32 %v1148_v6, %v1145_v41 }
 0x907   :  { %v1151_v44 = vrot.slane %v4159_v43, 6  ;;  %v4165_v45 = vsel %vm2086_vm6, %v4124_v32, %v4159_v43 }
 0x909   :  { %1152 = vrot.lane.b32.xlu0 %v1151_v44, %s3830_s6 }
 0x97b   :  { %v1153_v18 = vpop.permute.xlu0 %1152 }
 0x97c   :  { %v1154_v28 = vsel %vm221_vm5, %v1153_v18, 0 }
 0x97d   :  { %v1176_v46 = vand.u32 4294901760, %v1154_v28 }
 0x97f   :  { %v1177_v47 = vsub.f32 %v1154_v28, %v1176_v46  ;;  %1222 = vmatmul.f32.vlgmr.msrb.gmra.mxu1 %v1176_v46 }
 0x980   :  { %1499 = vmatpush.msrb.mxu1 %v3884_v5 }
 0x981   :  { %v1178_v48 = vand.u32 4294901760, %v1177_v47  ;;  %1252 = vmatmul.f32.vlgmr.msra.gmra.mxu2 %v1177_v47 }
 0x982   :  { %1501 = vmatpush.msrb.mxu1 %v3898_v11  ;;  %1528 = vmatpush.msra.mxu2 %v3920_v22 }
 0x983   :  { %v1179_v32 = vsub.f32 %v1177_v47, %v1178_v48  ;;  %1279 = vmatmul.f32.vlgmr.msra.gmra.mxu3 %v1178_v48 }
 0x984   :  { %1503 = vmatpush.msrb.mxu1 %v3900_v12  ;;  %1559 = vmatpush.msra.mxu3 %v3884_v5 }
 0x985   :  { %v1180_v55 = vand.u32 4294901760, %v1179_v32  ;;  %1532 = vmatpush.msra.mxu2 %v3927_v26 }
 0x986   :  { %1505 = vmatpush.msrb.mxu1 %v3910_v17  ;;  %1561 = vmatpush.msra.mxu3 %v3898_v11 }
 0x987   :  { %1181 = vmatmul.f32.vlgmr.msrb.gmra.mxu0 %v1180_v55  ;;  %1337 = vmatmul.f32.vlgmr.msra.gmra.mxu1 %v1176_v46 }
 0x988   :  { %1470 = vmatpush.msrb.mxu0 %v3906_v15  ;;  %1563 = vmatpush.msra.mxu3 %v3900_v12 }
 0x989   :  { %1536 = vmatpush.msra.mxu2 %v3930_v27  ;;  %1666 = vmatpush.msra.mxu1 %v3942_v35 }
 0x98a   :  { %1473 = vmatpush.msrb.mxu0 %v3914_v19  ;;  %1565 = vmatpush.msra.mxu3 %v3910_v17 }
 0x98b   :  { %1540 = vmatpush.msra.mxu2 %v3936_v30  ;;  %1672 = vmatpush.msra.mxu1 %v3947_v39 }
 0x98c   :  { %1476 = vmatpush.msrb.mxu0 %v3917_v20 }
 0x98d   :  { %1678 = vmatpush.msra.mxu1 %v3950_v40 }
 0x98e   :  { %1479 = vmatpush.msrb.mxu0 %v3924_v24 }
 0x98f   :  { %1312 = vmatmul.f32.vlgmr.msra.gmra.mxu0 %v1176_v46  ;;  %1684 = vmatpush.msra.mxu1 %v3954_v42 }
 0x990   :  { %1633 = vmatpush.msra.mxu0 %v3884_v5 }
 0x992   :  { %1635 = vmatpush.msra.mxu0 %v3898_v11 }
 0x994   :  { %1637 = vmatpush.msra.mxu0 %v3900_v12 }
 0x996   :  { %1639 = vmatpush.msra.mxu0 %v3910_v17 }
 0x9fc   :  { %v1223_v56 = vpop.f32.mrf.mxu1 }
 0xa04   :  { %v1182_v57 = vpop.f32.mrf.mxu0  ;;  %v1253_v62 = vpop.f32.mrf.mxu2 }
 0xa05   :  { %v1183_v58 = vadd.f32 %v1182_v57, %v4027_v54  ;;  %v1338_v7 = vpop.f32.mrf.mxu1 }
 0xa06   :  { %v1280_v1 = vpop.f32.mrf.mxu3 }
 0xa07   :  { %v1224_v60 = vadd.f32 %v1223_v56, %v1183_v58 }
 0xa09   :  { %v1254_v0 = vadd.f32 %v1253_v62, %v1224_v60 }
 0xa0b   :  { %v1281_v2 = vadd.f32 %v1280_v1, %v1254_v0 }
 0xa0c   :  { %v1313_v3 = vpop.f32.mrf.mxu0 }
 0xa0d   :  { %v1314_v4 = vadd.f32 %v1313_v3, %v1281_v2 }
 0xa0f   :  { %v1339_v9 = vadd.f32 %v1338_v7, %v1314_v4 }
 0xa11   :  { %1362 = vrot.lane.b32.xlu1 %v1339_v9, %s3829_s5  ;;  %v1341_v25 = vadd.f32 %v1339_v9, %v4205_v23 }
 0xa13   :  { %v3684_v29 = vmul.f32 -1.442695, %v1341_v25 }
 0xa15   :  { %3747 = vpow2.f32 %v3684_v29 }
 0xa1b   :  { %v3748_v31 = vpop.eup %3747 }
 0xa1c   :  { %v1345_v33 = vadd.f32 1.0, %v3748_v31 }
 0xa1e   :  { %3749 = vrcp.f32 %v1345_v33  ;;  %v1357_v50 = vand.u32 2147483648, %v1345_v33  ;;  %vm1351_vm8 = vweird.f32 %v1345_v33  ;;  %v1355_v52 = vand.u32 2147483647, %v1345_v33 }
 0xa20   :  { %v1358_v63 = vor.u32 1.1754944e-38, %v1357_v50  ;;  %vm1356_vm10 = vcmp.eq.f32.partialorder %v1355_v52, 8.507059e+37 }
 0xa24   :  { %v3750_v53 = vpop.eup %3749 }
 0xa25   :  { %v1347_v49 = vmul.f32 %v3750_v53, %v1345_v33  ;;  %vm1352_vm7 = vweird.f32 %v3750_v53 }
 0xa26   :  { %vm1353_vm9 = vmor %vm1351_vm8, %vm1352_vm7 }
 0xa27   :  { %v1348_v8 = vsub.f32 1.0, %v1347_v49 }
 0xa29   :  { %v1349_v51 = vmul.f32 %v3750_v53, %v1348_v8 }
 0xa2b   :  { %v1350_v34 = vadd.f32 %v3750_v53, %v1349_v51 }
 0xa2d   :  { %v1354_v61 = vsel %vm1353_vm9, %v3750_v53, %v1350_v34 }
 0xa2e   :  { %v1359_v37 = vsel %vm1356_vm10, %v1358_v63, %v1354_v61 }
 0xa2f   :  { %v1372_v18 = vsub.f32 1.0, %v1359_v37  ;;  %v1379_v46 = vmul.f32 %v1359_v37, %v1151_v44 }
 0xa83   :  { %v1363_v36 = vpop.permute.xlu1 %1362 }
 0xa84   :  { %v1365_v38 = vmul.f32 %v1363_v36, %v1359_v37 }
 0xa86   :  { %1367 = vrot.lane.b32.xlu2 %v1365_v38, %s3829_s5 }
 0xae0   :  { %v1368_v59 = vpop.permute.xlu2 %1367 }
 0xae1   :  { %v1370_v6 = vadd.f32 %v1368_v59, %v4205_v23 }
 0xae3   :  { %3751 = vtanh.f32 %v1370_v6 }
 0xae9   :  { %v3752_v41 = vpop.eup %3751 }
 0xaea   :  { %1374 = vrot.lane.b32.xlu0 %v3752_v41, %s3830_s6 }
 0xb5c   :  { %v1375_v28 = vpop.permute.xlu0 %1374 }
 0xb5d   :  { %v1377_v47 = vmul.f32 %v1375_v28, %v1372_v18 }
 0xb5f   :  { %v4213_v48 = vadd.f32 %v1379_v46, %v1377_v47 }
 0xb61   :  { %1382 = vrot.lane.b32.xlu1 %v4213_v48, %s3830_s6  ;;  %v1610_v38 = vrot.slane %v4213_v48, 6 }
 0xbd3   :  { %v1383_v32 = vpop.permute.xlu1 %1382 }
 0xbd4   :  { %v1384_v55 = vsel %vm221_vm5, %v1383_v32, 0 }
 0xbd5   :  { %v1406_v56 = vand.u32 4294901760, %v1384_v55 }
 0xbd7   :  { %v1407_v57 = vsub.f32 %v1384_v55, %v1406_v56  ;;  %1452 = vmatmul.f32.vlgmr.msrb.gmra.mxu3 %v1406_v56 }
 0xbd8   :  { %1733 = vmatpush.msrb.mxu3 %v3884_v5 }
 0xbd9   :  { %v1408_v58 = vand.u32 4294901760, %v1407_v57  ;;  %1482 = vmatmul.f32.vlgmr.msrb.gmra.mxu0 %v1407_v57 }
 0xbda   :  { %1735 = vmatpush.msrb.mxu3 %v3898_v11  ;;  %1762 = vmatpush.msrb.mxu0 %v3920_v22 }
 0xbdb   :  { %v1409_v43 = vsub.f32 %v1407_v57, %v1408_v58  ;;  %1509 = vmatmul.f32.vlgmr.msrb.gmra.mxu1 %v1408_v58 }
 0xbdc   :  { %1737 = vmatpush.msrb.mxu3 %v3900_v12  ;;  %1793 = vmatpush.msrb.mxu1 %v3884_v5 }
 0xbdd   :  { %v1410_v44 = vand.u32 4294901760, %v1409_v43  ;;  %1766 = vmatpush.msrb.mxu0 %v3927_v26 }
 0xbde   :  { %1739 = vmatpush.msrb.mxu3 %v3910_v17  ;;  %1795 = vmatpush.msrb.mxu1 %v3898_v11 }
 0xbdf   :  { %1411 = vmatmul.f32.vlgmr.msrb.gmra.mxu2 %v1410_v44  ;;  %1567 = vmatmul.f32.vlgmr.msra.gmra.mxu3 %v1406_v56 }
 0xbe0   :  { %1704 = vmatpush.msrb.mxu2 %v3906_v15  ;;  %1797 = vmatpush.msrb.mxu1 %v3900_v12 }
 0xbe1   :  { %1770 = vmatpush.msrb.mxu0 %v3930_v27  ;;  %1900 = vmatpush.msra.mxu3 %v3942_v35 }
 0xbe2   :  { %1707 = vmatpush.msrb.mxu2 %v3914_v19  ;;  %1799 = vmatpush.msrb.mxu1 %v3910_v17 }
 0xbe3   :  { %1774 = vmatpush.msrb.mxu0 %v3936_v30  ;;  %1906 = vmatpush.msra.mxu3 %v3947_v39 }
 0xbe4   :  { %1710 = vmatpush.msrb.mxu2 %v3917_v20 }
 0xbe5   :  { %1912 = vmatpush.msra.mxu3 %v3950_v40 }
 0xbe6   :  { %1713 = vmatpush.msrb.mxu2 %v3924_v24 }
 0xbe7   :  { %1542 = vmatmul.f32.vlgmr.msra.gmra.mxu2 %v1406_v56  ;;  %1918 = vmatpush.msra.mxu3 %v3954_v42 }
 0xbe8   :  { %1867 = vmatpush.msra.mxu2 %v3884_v5 }
 0xbea   :  { %1869 = vmatpush.msra.mxu2 %v3898_v11 }
 0xbec   :  { %1871 = vmatpush.msra.mxu2 %v3900_v12 }
 0xbee   :  { %1873 = vmatpush.msra.mxu2 %v3910_v17 }
 0xc56   :  { %v1483_v0 = vpop.f32.mrf.mxu0 }
 0xc58   :  { %v1510_v1 = vpop.f32.mrf.mxu1 }
 0xc5a   :  { %v1453_v35 = vpop.f32.mrf.mxu3 }
 0xc62   :  { %v1412_v60 = vpop.f32.mrf.mxu2  ;;  %v1568_v42 = vpop.f32.mrf.mxu3 }
 0xc63   :  { %v1413_v39 = vadd.f32 %v1412_v60, %v4027_v54 }
 0xc65   :  { %v1454_v62 = vadd.f32 %v1453_v35, %v1413_v39 }
 0xc67   :  { %v1484_v40 = vadd.f32 %v1483_v0, %v1454_v62 }
 0xc69   :  { %v1511_v2 = vadd.f32 %v1510_v1, %v1484_v40 }
 0xc6a   :  { %v1543_v3 = vpop.f32.mrf.mxu2 }
 0xc6b   :  { %v1544_v4 = vadd.f32 %v1543_v3, %v1511_v2 }
 0xc6d   :  { %v1569_v7 = vadd.f32 %v1568_v42, %v1544_v4 }
 0xc6f   :  { %v1572_v9 = vrot.slane %v1569_v7, 6 }
 0xc71   :  { %1594 = vrot.lane.b32.xlu2 %v1572_v9, %s3829_s5  ;;  %v1574_v10 = vadd.f32 %v1572_v9, %v4205_v23 }
 0xc73   :  { %v3685_v13 = vmul.f32 -1.442695, %v1574_v10 }
 0xc75   :  { %3753 = vpow2.f32 %v3685_v13 }
 0xc7b   :  { %v3754_v14 = vpop.eup %3753 }
 0xc7c   :  { %v1578_v16 = vadd.f32 1.0, %v3754_v14 }
 0xc7e   :  { %3755 = vrcp.f32 %v1578_v16  ;;  %v1590_v53 = vand.u32 2147483648, %v1578_v16  ;;  %vm1584_vm12 = vweird.f32 %v1578_v16  ;;  %v1588_v49 = vand.u32 2147483647, %v1578_v16 }
 0xc80   :  { %v1591_v51 = vor.u32 1.1754944e-38, %v1590_v53  ;;  %vm1589_vm1 = vcmp.eq.f32.partialorder %v1588_v49, 8.507059e+37 }
 0xc84   :  { %v3756_v21 = vpop.eup %3755 }
 0xc85   :  { %v1580_v25 = vmul.f32 %v3756_v21, %v1578_v16  ;;  %vm1585_vm11 = vweird.f32 %v3756_v21 }
 0xc86   :  { %vm1586_vm13 = vmor %vm1584_vm12, %vm1585_vm11 }
 0xc87   :  { %v1581_v29 = vsub.f32 1.0, %v1580_v25 }
 0xc89   :  { %v1582_v31 = vmul.f32 %v3756_v21, %v1581_v29 }
 0xc8b   :  { %v1583_v33 = vadd.f32 %v3756_v21, %v1582_v31 }
 0xc8d   :  { %v1587_v8 = vsel %vm1586_vm13, %v3756_v21, %v1583_v33  ;;  %vm3662_vm13 = vcmask 0  }
 0xc8e   :  { %v1592_v50 = vsel %vm1589_vm1, %v1591_v51, %v1587_v8 }
 0xc8f   :  { %v1604_v37 = vsub.f32 1.0, %v1592_v50  ;;  %v1612_v41 = vmul.f32 %v1610_v38, %v1592_v50 }
 0xccb   :  { %v1595_v34 = vpop.permute.xlu2 %1594 }
 0xccc   :  { %v1597_v52 = vmul.f32 %v1595_v34, %v1592_v50 }
 0xcce   :  { %1599 = vrot.lane.b32.xlu0 %v1597_v52, %s3829_s5 }
 0xd40   :  { %v1600_v61 = vpop.permute.xlu0 %1599 }
 0xd41   :  { %v1602_v63 = vadd.f32 %v1600_v61, %v4205_v23 }
 0xd43   :  { %3757 = vtanh.f32 %v1602_v63 }
 0xd49   :  { %v3758_v36 = vpop.eup %3757 }
 0xd4a   :  { %1606 = vrot.lane.b32.xlu1 %v3758_v36, %s3830_s6 }
 0xdbc   :  { %v1607_v59 = vpop.permute.xlu1 %1606 }
 0xdbd   :  { %v1609_v6 = vmul.f32 %v1607_v59, %v1604_v37 }
 0xdbf   :  { %v4249_v18 = vadd.f32 %v1612_v41, %v1609_v6 }
 0xdc1   :  { %v1615_v28 = vrot.slane %v4249_v18, 2  ;;  %v1844_v29 = vrot.slane %v4249_v18, 6  ;;  %v2088_v8 = vsel %vm2082_vm14, %v4213_v48, %v4249_v18 }
 0xdc3   :  { %1616 = vrot.lane.b32.xlu2 %v1615_v28, %s3830_s6 }
 0xe1d   :  { %v1617_v46 = vpop.permute.xlu2 %1616 }
 0xe1e   :  { %v1618_v47 = vsel %vm221_vm5, %v1617_v46, 0 }
 0xe1f   :  { %v1640_v32 = vand.u32 4294901760, %v1618_v47 }
 0xe21   :  { %v1641_v55 = vsub.f32 %v1618_v47, %v1640_v32  ;;  %1686 = vmatmul.f32.vlgmr.msra.gmra.mxu1 %v1640_v32 }
 0xe22   :  { %1967 = vmatpush.msra.mxu1 %v3884_v5 }
 0xe23   :  { %v1642_v56 = vand.u32 4294901760, %v1641_v55  ;;  %1716 = vmatmul.f32.vlgmr.msrb.gmra.mxu2 %v1641_v55 }
 0xe24   :  { %1969 = vmatpush.msra.mxu1 %v3898_v11  ;;  %1996 = vmatpush.msrb.mxu2 %v3920_v22 }
 0xe25   :  { %v1643_v57 = vsub.f32 %v1641_v55, %v1642_v56  ;;  %1743 = vmatmul.f32.vlgmr.msrb.gmra.mxu3 %v1642_v56 }
 0xe26   :  { %1971 = vmatpush.msra.mxu1 %v3900_v12  ;;  %2027 = vmatpush.msrb.mxu3 %v3884_v5 }
 0xe27   :  { %v1644_v58 = vand.u32 4294901760, %v1643_v57  ;;  %2000 = vmatpush.msrb.mxu2 %v3927_v26 }
 0xe28   :  { %1973 = vmatpush.msra.mxu1 %v3910_v17  ;;  %2029 = vmatpush.msrb.mxu3 %v3898_v11 }
 0xe29   :  { %1645 = vmatmul.f32.vlgmr.msra.gmra.mxu0 %v1644_v58  ;;  %1801 = vmatmul.f32.vlgmr.msrb.gmra.mxu1 %v1640_v32 }
 0xe2a   :  { %1938 = vmatpush.msra.mxu0 %v3906_v15  ;;  %2031 = vmatpush.msrb.mxu3 %v3900_v12 }
 0xe2b   :  { %2004 = vmatpush.msrb.mxu2 %v3930_v27 }
 0xe2c   :  { %1941 = vmatpush.msra.mxu0 %v3914_v19  ;;  %2033 = vmatpush.msrb.mxu3 %v3910_v17 }
 0xe2d   :  { %2008 = vmatpush.msrb.mxu2 %v3936_v30 }
 0xe2e   :  { %1944 = vmatpush.msra.mxu0 %v3917_v20 }
 0xe30   :  { %1947 = vmatpush.msra.mxu0 %v3924_v24 }
 0xe31   :  { %1776 = vmatmul.f32.vlgmr.msrb.gmra.mxu0 %v1640_v32 }
 0xe9e   :  { %v1687_v5 = vpop.f32.mrf.mxu1 }
 0xea6   :  { %v1646_v11 = vpop.f32.mrf.mxu0  ;;  %v1717_v26 = vpop.f32.mrf.mxu2 }
 0xea7   :  { %v1647_v22 = vadd.f32 %v1646_v11, %v4027_v54  ;;  %v1802_v35 = vpop.f32.mrf.mxu1 }
 0xea8   :  { %v1744_v43 = vpop.f32.mrf.mxu3 }
 0xea9   :  { %v1688_v15 = vadd.f32 %v1687_v5, %v1647_v22 }
 0xeab   :  { %v1718_v12 = vadd.f32 %v1717_v26, %v1688_v15  ;;  %v27_v26 = vld [vmem:[%s4613_s1 + $0x38] sm:$0xff] }
 0xead   :  { %v1745_v27 = vadd.f32 %v1744_v43, %v1718_v12  ;;  %v2116_v43 = vand.u32 4294901760, %v27_v26 }
 0xeae   :  { %v1777_v44 = vpop.f32.mrf.mxu0 }
 0xeaf   :  { %v1778_v19 = vadd.f32 %v1777_v44, %v1745_v27 }
 0xeb1   :  { %v1803_v17 = vadd.f32 %v1802_v35, %v1778_v19  ;;  %v2158_v19 = vsub.f32 %v27_v26, %v2116_v43  ;;  %v30_v26 = vld [vmem:[%s4613_s1 + $0x50] sm:$0xff] }
 0xeb3   :  { %v1806_v60 = vrot.slane %v1803_v17, 4  ;;  %v25_v17 = vld [vmem:[%s4613_s1 + $0x28] sm:$0xff] }
 0xeb5   :  { %1828 = vrot.lane.b32.xlu0 %v1806_v60, %s3829_s5  ;;  %v1808_v20 = vadd.f32 %v1806_v60, %v4205_v23 }
 0xeb7   :  { %v3686_v24 = vmul.f32 -1.442695, %v1808_v20  ;;  %v2159_v20 = vand.u32 4294901760, %v2158_v19 }
 0xeb9   :  { %3759 = vpow2.f32 %v3686_v24 }
 0xebf   :  { %v3760_v30 = vpop.eup %3759 }
 0xec0   :  { %v1812_v39 = vadd.f32 1.0, %v3760_v30  ;;  %v2120_v30 = vand.u32 4294901760, %v25_v17 }
 0xec2   :  { %3761 = vrcp.f32 %v1812_v39  ;;  %v1824_v3 = vand.u32 2147483648, %v1812_v39  ;;  %vm1818_vm3 = vweird.f32 %v1812_v39  ;;  %v1822_v4 = vand.u32 2147483647, %v1812_v39 }
 0xec4   :  { %v1825_v7 = vor.u32 1.1754944e-38, %v1824_v3  ;;  %vm1823_vm7 = vcmp.eq.f32.partialorder %v1822_v4, 8.507059e+37 }
 0xec8   :  { %v3762_v62 = vpop.eup %3761 }
 0xec9   :  { %v1814_v0 = vmul.f32 %v3762_v62, %v1812_v39  ;;  %vm1819_vm2 = vweird.f32 %v3762_v62 }
 0xeca   :  { %vm1820_vm4 = vmor %vm1818_vm3, %vm1819_vm2 }
 0xecb   :  { %v1815_v40 = vsub.f32 1.0, %v1814_v0 }
 0xecd   :  { %v1816_v1 = vmul.f32 %v3762_v62, %v1815_v40  ;;  %v2170_v40 = vsub.f32 %v25_v17, %v2120_v30 }
 0xecf   :  { %v1817_v2 = vadd.f32 %v3762_v62, %v1816_v1  ;;  %v2171_v3 = vand.u32 4294901760, %v2170_v40 }
 0xed1   :  { %v1821_v42 = vsel %vm1820_vm4, %v3762_v62, %v1817_v2  ;;  %v2160_v62 = vsub.f32 %v2158_v19, %v2159_v20 }
 0xed2   :  { %v1826_v10 = vsel %vm1823_vm7, %v1825_v7, %v1821_v42  ;;  %v2172_v42 = vsub.f32 %v2170_v40, %v2171_v3 }
 0xed3   :  { %v1838_v25 = vsub.f32 1.0, %v1826_v10  ;;  %v1846_v33 = vmul.f32 %v1844_v29, %v1826_v10  ;;  %v2161_v1 = vand.u32 4294901760, %v2160_v62 }
 0xf27   :  { %v1829_v9 = vpop.permute.xlu0 %1828 }
 0xf28   :  { %v1831_v13 = vmul.f32 %v1829_v9, %v1826_v10  ;;  %v2173_v9 = vand.u32 4294901760, %v2172_v42 }
 0xf2a   :  { %1833 = vrot.lane.b32.xlu1 %v1831_v13, %s3829_s5 }
 0xf9c   :  { %v1834_v14 = vpop.permute.xlu1 %1833 }
 0xf9d   :  { %v1836_v16 = vadd.f32 %v1834_v14, %v4205_v23 }
 0xf9f   :  { %3763 = vtanh.f32 %v1836_v16 }
 0xfa5   :  { %v3764_v21 = vpop.eup %3763 }
 0xfa6   :  { %1840 = vrot.lane.b32.xlu2 %v3764_v21, %s3830_s6 }
0x1000   :  { %v1841_v31 = vpop.permute.xlu2 %1840 }
0x1001   :  { %v1843_v53 = vmul.f32 %v1841_v31, %v1838_v25 }
0x1003   :  { %v4277_v49 = vadd.f32 %v1846_v33, %v1843_v53 }
0x1005   :  { %v1849_v51 = vrot.slane %v4277_v49, 4  ;;  %v4285_v34 = vsel %vm2084_vm15, %v2088_v8, %v4277_v49 }
0x1007   :  { %1850 = vrot.lane.b32.xlu0 %v1849_v51, %s3830_s6 }
0x1079   :  { %v1851_v50 = vpop.permute.xlu0 %1850 }
0x107a   :  { %v1852_v52 = vsel %vm221_vm5, %v1851_v50, 0 }
0x107b   :  { %v1874_v61 = vand.u32 4294901760, %v1852_v52 }
0x107d   :  { %v1875_v63 = vsub.f32 %v1852_v52, %v1874_v61  ;;  %1920 = vmatmul.f32.vlgmr.msra.gmra.mxu3 %v1874_v61 }
0x107f   :  { %v1876_v36 = vand.u32 4294901760, %v1875_v63  ;;  %1950 = vmatmul.f32.vlgmr.msra.gmra.mxu0 %v1875_v63 }
0x1081   :  { %v1877_v37 = vsub.f32 %v1875_v63, %v1876_v36  ;;  %1977 = vmatmul.f32.vlgmr.msra.gmra.mxu1 %v1876_v36 }
0x1083   :  { %v1878_v38 = vand.u32 4294901760, %v1877_v37 }
0x1085   :  { %1879 = vmatmul.f32.vlgmr.msra.gmra.mxu2 %v1878_v38  ;;  %2035 = vmatmul.f32.vlgmr.msrb.gmra.mxu3 %v1874_v61 }
0x108d   :  { %2010 = vmatmul.f32.vlgmr.msrb.gmra.mxu2 %v1874_v61 }
0x10fc   :  { %v1951_v18 = vpop.f32.mrf.mxu0 }
0x10fe   :  { %v1978_v46 = vpop.f32.mrf.mxu1 }
0x1100   :  { %v1921_v48 = vpop.f32.mrf.mxu3 }
0x1108   :  { %v1880_v59 = vpop.f32.mrf.mxu2  ;;  %v2036_v56 = vpop.f32.mrf.mxu3 }
0x1109   :  { %v1881_v6 = vadd.f32 %v1880_v59, %v4027_v54  ;;  %v28_v54 = vld [vmem:[%s4613_s1 + $0x40] sm:$0xff] }
0x110a   :  { %v2114_v15 = vand.u32 4294901760, %v28_v54 }
0x110b   :  { %v1922_v41 = vadd.f32 %v1921_v48, %v1881_v6 }
0x110c   :  { %v2152_v12 = vsub.f32 %v28_v54, %v2114_v15  ;;  %2232 = vmatpush.msra.mxu3 %v2114_v15  ;;  %2115 = vmatpush.msrb.mxu0 %v2114_v15  ;;  %v31_v54 = vld [vmem:[%s4613_s1 + $0x58] sm:$0xff] }
0x110d   :  { %v1952_v28 = vadd.f32 %v1951_v18, %v1922_v41  ;;  %v2078_v41 = vrot.slane %v4277_v49, 6 }
0x110e   :  { %v2153_v44 = vand.u32 4294901760, %v2152_v12  ;;  %2198 = vmatpush.msra.mxu2 %v2152_v12  ;;  %2234 = vmatpush.msra.mxu3 %v2116_v43 }
0x110f   :  { %v1979_v47 = vadd.f32 %v1978_v46, %v1952_v28  ;;  %2117 = vmatpush.msrb.mxu0 %v2116_v43 }
0x1110   :  { %v2011_v32 = vpop.f32.mrf.mxu2  ;;  %v2154_v60 = vsub.f32 %v2152_v12, %v2153_v44  ;;  %2201 = vmatpush.msra.mxu2 %v2158_v19 }
0x1111   :  { %v2012_v55 = vadd.f32 %v2011_v32, %v1979_v47 }
0x1112   :  { %v2155_v39 = vand.u32 4294901760, %v2154_v60 }
0x1113   :  { %v2037_v57 = vadd.f32 %v2036_v56, %v2012_v55 }
0x1114   :  { %2156 = vmatpush.msrb.mxu1 %v2155_v39 }
0x1115   :  { %v2040_v58 = vrot.slane %v2037_v57, 2 }
0x1116   :  { %2162 = vmatpush.msrb.mxu1 %v2161_v1 }
0x1117   :  { %2062 = vrot.lane.b32.xlu1 %v2040_v58, %s3829_s5  ;;  %v2042_v5 = vadd.f32 %v2040_v58, %v4205_v23 }
0x1119   :  { %v3687_v11 = vmul.f32 -1.442695, %v2042_v5 }
0x111b   :  { %3765 = vpow2.f32 %v3687_v11 }
0x111f   :  { %2094 = vrot.lane.b32.xlu1 %v4165_v45, %s3830_s6  ;;  %v26_v45 = vld [vmem:[%s4613_s1 + $0x30] sm:$0xff] }
0x1120   :  { %v2118_v35 = vand.u32 4294901760, %v26_v45 }
0x1121   :  { %v3766_v22 = vpop.eup %3765 }
0x1122   :  { %v2046_v27 = vadd.f32 1.0, %v3766_v22  ;;  %v2164_v24 = vsub.f32 %v26_v45, %v2118_v35  ;;  %2236 = vmatpush.msra.mxu3 %v2118_v35  ;;  %2119 = vmatpush.msrb.mxu0 %v2118_v35  ;;  %v29_v45 = vld [vmem:[%s4613_s1 + $0x48] sm:$0xff] }
0x1123   :  { %v2345_v17 = vand.u32 4294901760, %v29_v45 }
0x1124   :  { %3767 = vrcp.f32 %v2046_v27  ;;  %v2165_v0 = vand.u32 4294901760, %v2164_v24  ;;  %2204 = vmatpush.msra.mxu2 %v2164_v24  ;;  %2238 = vmatpush.msra.mxu3 %v2120_v30  ;;  %v2058_v21 = vand.u32 2147483648, %v2046_v27  ;;  %vm2052_vm8 = vweird.f32 %v2046_v27 }
0x1125   :  { %2121 = vmatpush.msrb.mxu0 %v2120_v30  ;;  %v2056_v25 = vand.u32 2147483647, %v2046_v27 }
0x1126   :  { %v2166_v2 = vsub.f32 %v2164_v24, %v2165_v0  ;;  %2207 = vmatpush.msra.mxu2 %v2170_v40  ;;  %v2059_v31 = vor.u32 1.1754944e-38, %v2058_v21 }
0x1127   :  { %2267 = vmatpush.msra.mxu0 %v2153_v44  ;;  %vm2057_vm10 = vcmp.eq.f32.partialorder %v2056_v25, 8.507059e+37 }
0x1128   :  { %v2167_v4 = vand.u32 4294901760, %v2166_v2 }
0x1129   :  { %2271 = vmatpush.msra.mxu0 %v2159_v20 }
0x112a   :  { %v3768_v7 = vpop.eup %3767  ;;  %2168 = vmatpush.msrb.mxu1 %v2167_v4  ;;  %v3799_v4 = vld [vmem:[%s4614_s2] sm:$0xf] }
0x112b   :  { %2275 = vmatpush.msra.mxu0 %v2165_v0  ;;  %v2048_v10 = vmul.f32 %v3768_v7, %v2046_v27  ;;  %vm2053_vm14 = vweird.f32 %v3768_v7  ;;  %v2343_v27 = vand.u32 4294901760, %v30_v26  ;;  %v2091_v42 = vperm.slane %v3799_v4, 2 }
0x112c   :  { %2174 = vmatpush.msrb.mxu1 %v2173_v9  ;;  %vm2054_vm9 = vmor %vm2052_vm8, %vm2053_vm14 }
0x112d   :  { %2279 = vmatpush.msra.mxu0 %v2171_v3  ;;  %v2049_v13 = vsub.f32 1.0, %v2048_v10 }
0x112e   :  { %2302 = vmatpush.msra.mxu1 %v2114_v15  ;;  %v2341_v15 = vand.u32 4294901760, %v31_v54 }
0x112f   :  { %v2050_v14 = vmul.f32 %v3768_v7, %v2049_v13 }
0x1130   :  { %2304 = vmatpush.msra.mxu1 %v2116_v43  ;;  %v2383_v43 = vsub.f32 %v31_v54, %v2341_v15 }
0x1131   :  { %v2051_v16 = vadd.f32 %v3768_v7, %v2050_v14 }
0x1132   :  { %2306 = vmatpush.msra.mxu1 %v2118_v35  ;;  %v2384_v19 = vand.u32 4294901760, %v2383_v43  ;;  %v2389_v35 = vsub.f32 %v30_v26, %v2343_v27 }
0x1133   :  { %v2055_v29 = vsel %vm2054_vm9, %v3768_v7, %v2051_v16 }
0x1134   :  { %2308 = vmatpush.msra.mxu1 %v2120_v30  ;;  %v2060_v53 = vsel %vm2057_vm10, %v2059_v31, %v2055_v29  ;;  %v2385_v20 = vsub.f32 %v2383_v43, %v2384_v19  ;;  %v2390_v24 = vand.u32 4294901760, %v2389_v35  ;;  %v2395_v30 = vsub.f32 %v29_v45, %v2345_v17 }
0x1135   :  { %v2072_v6 = vsub.f32 1.0, %v2060_v53  ;;  %v2080_v28 = vmul.f32 %v2078_v41, %v2060_v53 }
0x1136   :  { %v2386_v39 = vand.u32 4294901760, %v2385_v20  ;;  %v2391_v62 = vsub.f32 %v2389_v35, %v2390_v24  ;;  %v2396_v0 = vand.u32 4294901760, %v2395_v30 }
0x1138   :  { %v2392_v40 = vand.u32 4294901760, %v2391_v62  ;;  %v2397_v1 = vsub.f32 %v2395_v30, %v2396_v0 }
0x113a   :  { %v2398_v2 = vand.u32 4294901760, %v2397_v1 }
0x1189   :  { %v2063_v33 = vpop.permute.xlu1 %2062 }
0x118a   :  { %v2065_v8 = vmul.f32 %v2063_v33, %v2060_v53 }
0x118c   :  { %2067 = vrot.lane.b32.xlu2 %v2065_v8, %s3829_s5  ;;  %s3836_s5 = smov 12  }
0x1191   :  { %v2095_v51 = vpop.permute.xlu1 %2094 }
0x1192   :  { %v2098_v50 = vsel %vm221_vm5, %v2095_v51, 0 }
0x1193   :  { %v2122_v52 = vand.u32 4294901760, %v2098_v50 }
0x1195   :  { %v2123_v61 = vsub.f32 %v2098_v50, %v2122_v52  ;;  %2176 = vmatmul.f32.vlgmr.msrb.gmra.mxu1 %v2122_v52 }
0x1197   :  { %v2124_v63 = vand.u32 4294901760, %v2123_v61  ;;  %2210 = vmatmul.f32.vlgmr.msra.gmra.mxu2 %v2123_v61 }
0x1199   :  { %v2125_v36 = vsub.f32 %v2123_v61, %v2124_v63  ;;  %2242 = vmatmul.f32.vlgmr.msra.gmra.mxu3 %v2124_v63 }
0x119b   :  { %v2126_v37 = vand.u32 4294901760, %v2125_v36 }
0x119d   :  { %2127 = vmatmul.f32.vlgmr.msrb.gmra.mxu0 %v2126_v37 }
0x11e6   :  { %v2068_v38 = vpop.permute.xlu2 %2067 }
0x11e7   :  { %v2070_v48 = vadd.f32 %v2068_v38, %v4205_v23 }
0x11e9   :  { %3769 = vtanh.f32 %v2070_v48 }
0x11ef   :  { %v3770_v59 = vpop.eup %3769 }
0x11f0   :  { %2074 = vrot.lane.b32.xlu0 %v3770_v59, %s3830_s6 }
0x1212   :  { %v2177_v3 = vpop.f32.mrf.mxu1 }
0x121a   :  { %v2128_v7 = vpop.f32.mrf.mxu0  ;;  %v2211_v16 = vpop.f32.mrf.mxu2 }
0x121b   :  { %v2129_v9 = vadd.f32 %v2128_v7, %v2091_v42 }
0x121c   :  { %v2243_v29 = vpop.f32.mrf.mxu3 }
0x121d   :  { %v2178_v13 = vadd.f32 %v2177_v3, %v2129_v9 }
0x121f   :  { %v2212_v21 = vadd.f32 %v2211_v16, %v2178_v13 }
0x1221   :  { %v2244_v31 = vadd.f32 %v2243_v29, %v2212_v21 }
0x1262   :  { %v2075_v18 = vpop.permute.xlu0 %2074 }
0x1263   :  { %v2077_v46 = vmul.f32 %v2075_v18, %v2072_v6 }
0x1265   :  { %v2081_v47 = vadd.f32 %v2080_v28, %v2077_v46 }
0x1267   :  { %v2090_v32 = vsel %vm2086_vm6, %v4285_v34, %v2081_v47  ;;  %v32_v34 = vld [vmem:[%s4613_s1 + $0x60] sm:$0xff]  ;;  %vm3033_vm6 = vcmask 97280  }
0x1268   :  { %2096 = vrot.lane.b32.xlu2 %v2090_v32, %s3830_s6  ;;  %v2339_v11 = vand.u32 4294901760, %v32_v34  ;;  %s3840_s6 = smov 120  }
0x126a   :  { %2340 = vmatpush.msrb.mxu2 %v2339_v11  ;;  %v2377_v22 = vsub.f32 %v32_v34, %v2339_v11  ;;  %2457 = vmatpush.msrb.mxu1 %v2339_v11 }
0x126c   :  { %v2378_v12 = vand.u32 4294901760, %v2377_v22  ;;  %2423 = vmatpush.msrb.mxu0 %v2377_v22  ;;  %2342 = vmatpush.msrb.mxu2 %v2341_v15 }
0x126d   :  { %2459 = vmatpush.msrb.mxu1 %v2341_v15 }
0x126e   :  { %v2379_v44 = vsub.f32 %v2377_v22, %v2378_v12  ;;  %2426 = vmatpush.msrb.mxu0 %v2383_v43  ;;  %2344 = vmatpush.msrb.mxu2 %v2343_v27 }
0x126f   :  { %2461 = vmatpush.msrb.mxu1 %v2343_v27 }
0x1270   :  { %v2380_v60 = vand.u32 4294901760, %v2379_v44  ;;  %2429 = vmatpush.msrb.mxu0 %v2389_v35  ;;  %2346 = vmatpush.msrb.mxu2 %v2345_v17 }
0x1271   :  { %2463 = vmatpush.msrb.mxu1 %v2345_v17 }
0x1272   :  { %2492 = vmatpush.msra.mxu2 %v2378_v12  ;;  %2381 = vmatpush.msrb.mxu3 %v2380_v60 }
0x1273   :  { %2432 = vmatpush.msrb.mxu0 %v2395_v30 }
0x1274   :  { %2496 = vmatpush.msra.mxu2 %v2384_v19  ;;  %2387 = vmatpush.msrb.mxu3 %v2386_v39 }
0x1276   :  { %2500 = vmatpush.msra.mxu2 %v2390_v24  ;;  %2393 = vmatpush.msrb.mxu3 %v2392_v40 }
0x1278   :  { %2504 = vmatpush.msra.mxu2 %v2396_v0  ;;  %2399 = vmatpush.msrb.mxu3 %v2398_v2  ;;  %v34_v2 = vld [vmem:[%s4615_s3] sm:$0xff]  ;;  %s3831_s3 = smov 124  }
0x127a   :  { %2527 = vmatpush.msra.mxu3 %v2339_v11  ;;  %v2320_v11 = vperm.slane %v3799_v4, 3  ;;  %v2589_v4 = vsel %vm2084_vm15, %v34_v2, 0 }
0x127c   :  { %2529 = vmatpush.msra.mxu3 %v2341_v15 }
0x127e   :  { %2531 = vmatpush.msra.mxu3 %v2343_v27 }
0x1280   :  { %2533 = vmatpush.msra.mxu3 %v2345_v17 }
0x12c2   :  { %v2097_v55 = vpop.permute.xlu2 %2096 }
0x12c3   :  { %v2100_v56 = vsel %vm221_vm5, %v2097_v55, 0 }
0x12c4   :  { %v2130_v23 = vand.u32 4294901760, %v2100_v56 }
0x12c6   :  { %v2131_v57 = vsub.f32 %v2100_v56, %v2130_v23  ;;  %2180 = vmatmul.f32.gmra.mxu1 %v2130_v23 }
0x12c8   :  { %2215 = vmatmul.f32.gmra.mxu2 %v2131_v57  ;;  %v2132_v58 = vand.u32 4294901760, %v2131_v57 }
0x12ca   :  { %2248 = vmatmul.f32.gmra.mxu3 %v2132_v58  ;;  %v2133_v5 = vsub.f32 %v2131_v57, %v2132_v58 }
0x12cc   :  { %v2134_v49 = vand.u32 4294901760, %v2133_v5 }
0x12ce   :  { %2135 = vmatmul.f32.gmra.mxu0 %v2134_v49  ;;  %2310 = vmatmul.f32.vlgmr.msra.gmra.mxu1 %v2122_v52 }
0x12d6   :  { %2281 = vmatmul.f32.vlgmr.msra.gmra.mxu0 %v2122_v52  ;;  %2314 = vmatmul.f32.gmra.mxu1 %v2130_v23 }
0x12de   :  { %2285 = vmatmul.f32.gmra.mxu0 %v2130_v23 }
0x1343   :  { %v2181_v10 = vpop.f32.mrf.mxu1 }
0x134b   :  { %v2136_v14 = vpop.f32.mrf.mxu0  ;;  %v2311_v53 = vpop.f32.mrf.mxu1 }
0x134c   :  { %v2137_v25 = vadd.f32 %v2136_v14, %v2091_v42  ;;  %v2216_v50 = vpop.f32.mrf.mxu2  ;;  %v2823_v42 = vrot.slane %v34_v2, 4 }
0x134d   :  { %v2249_v36 = vpop.f32.mrf.mxu3 }
0x134e   :  { %v2182_v33 = vadd.f32 %v2181_v10, %v2137_v25  ;;  %v2606_v10 = vand.u32 4294901760, %v2589_v4  ;;  %v2830_v14 = vsel %vm2084_vm15, %v2823_v42, 0 }
0x134f   :  { %v4342_v25 = vand.u32 4294901760, %v2830_v14 }
0x1350   :  { %v2217_v52 = vadd.f32 %v2216_v50, %v2182_v33  ;;  %2607 = vmatpush.msra.mxu0 %v2606_v10  ;;  %v2641_v21 = vsub.f32 %v2589_v4, %v2606_v10 }
0x1352   :  { %v2250_v37 = vadd.f32 %v2249_v36, %v2217_v52 }
0x1353   :  { %v2282_v8 = vpop.f32.mrf.mxu0  ;;  %v2315_v18 = vpop.f32.mrf.mxu1 }
0x1354   :  { %v2283_v51 = vadd.f32 %v2282_v8, %v2244_v31  ;;  %v2642_v31 = vand.u32 4294901760, %v2641_v21 }
0x1356   :  { %v2312_v61 = vadd.f32 %v2311_v53, %v2283_v51  ;;  %v2643_v53 = vsub.f32 %v2641_v21, %v2642_v31 }
0x1358   :  { %v2318_v63 = vmax.f32 %v2312_v61, 0.0  ;;  %v2644_v50 = vand.u32 4294901760, %v2643_v53 }
0x135a   :  { %v2322_v38 = vsel %vm221_vm5, %v2318_v63, 0  ;;  %2645 = vmatpush.msra.mxu1 %v2644_v50  ;;  %v2768_v50 = vlaneseq }
0x135b   :  { %v2347_v48 = vand.u32 4294901760, %v2322_v38  ;;  %v2286_v59 = vpop.f32.mrf.mxu0 }
0x135c   :  { %v2287_v6 = vadd.f32 %v2286_v59, %v2250_v37 }
0x135d   :  { %v2348_v41 = vsub.f32 %v2322_v38, %v2347_v48  ;;  %2401 = vmatmul.f32.vlgmr.msrb.gmra.mxu3 %v2347_v48 }
0x135e   :  { %v2316_v28 = vadd.f32 %v2315_v18, %v2287_v6  ;;  %2700 = vmatpush.msrb.mxu3 %v2606_v10 }
0x135f   :  { %2435 = vmatmul.f32.vlgmr.msrb.gmra.mxu0 %v2348_v41  ;;  %v2349_v46 = vand.u32 4294901760, %v2348_v41 }
0x1360   :  { %v2319_v47 = vmax.f32 %v2316_v28, 0.0  ;;  %2732 = vmatpush.msrb.mxu0 %v2642_v31  ;;  %v4353_v28 = vld [vmem:[%s4612_s0 + $0x8] sm:$0xff] }
0x1361   :  { %2467 = vmatmul.f32.vlgmr.msrb.gmra.mxu1 %v2349_v46  ;;  %v2350_v32 = vsub.f32 %v2348_v41, %v2349_v46  ;;  %v4359_v46 = vld [vmem:[%s4612_s0] sm:$0xff]  ;;  %s3834_s0 = smov 4  }
0x1362   :  { %v2325_v55 = vsel %vm221_vm5, %v2319_v47, 0  ;;  %2758 = vmatpush.msrb.mxu1 %v2606_v10  ;;  %2577 = vrot.lane.b32.xlu2 %v4359_v46, %s3832_s27  ;;  %vm2583_vm5 = vcmask 31744  }
0x1363   :  { %v2355_v56 = vand.u32 4294901760, %v2325_v55  ;;  %v2351_v23 = vand.u32 4294901760, %v2350_v32 }
0x1365   :  { %2352 = vmatmul.f32.vlgmr.msrb.gmra.mxu2 %v2351_v23  ;;  %2405 = vmatmul.f32.gmra.mxu3 %v2355_v56  ;;  %v2356_v57 = vsub.f32 %v2325_v55, %v2355_v56 }
0x1366   :  { %2672 = vmatpush.msrb.mxu2 %v2641_v21 }
0x1367   :  { %2440 = vmatmul.f32.gmra.mxu0 %v2356_v57  ;;  %v2357_v58 = vand.u32 4294901760, %v2356_v57 }
0x1369   :  { %2473 = vmatmul.f32.gmra.mxu1 %v2357_v58  ;;  %v2358_v5 = vsub.f32 %v2356_v57, %v2357_v58 }
0x136b   :  { %v2359_v49 = vand.u32 4294901760, %v2358_v5 }
0x136d   :  { %2360 = vmatmul.f32.gmra.mxu2 %v2359_v49  ;;  %2535 = vmatmul.f32.vlgmr.msra.gmra.mxu3 %v2347_v48 }
0x1375   :  { %2506 = vmatmul.f32.vlgmr.msra.gmra.mxu2 %v2347_v48  ;;  %2539 = vmatmul.f32.gmra.mxu3 %v2355_v56 }
0x1376   :  { %2848 = vmatpush.msra.mxu2 %v4342_v25 }
0x137d   :  { %2510 = vmatmul.f32.gmra.mxu2 %v2355_v56 }
0x13dc   :  { %v2436_v12 = vpop.f32.mrf.mxu0 }
0x13de   :  { %v2468_v44 = vpop.f32.mrf.mxu1 }
0x13e0   :  { %v2402_v34 = vpop.f32.mrf.mxu3 }
0x13e4   :  { %v2441_v24 = vpop.f32.mrf.mxu0 }
0x13e6   :  { %v2474_v0 = vpop.f32.mrf.mxu1 }
0x13e8   :  { %v2353_v54 = vpop.f32.mrf.mxu2  ;;  %v2406_v15 = vpop.f32.mrf.mxu3 }
0x13e9   :  { %v2354_v22 = vadd.f32 %v2353_v54, %v2320_v11 }
0x13eb   :  { %v2403_v26 = vadd.f32 %v2402_v34, %v2354_v22 }
0x13ed   :  { %v2437_v45 = vadd.f32 %v2436_v12, %v2403_v26 }
0x13ef   :  { %v2469_v35 = vadd.f32 %v2468_v44, %v2437_v45  ;;  %v2578_v45 = vpop.permute.xlu2 %2577 }
0x13f0   :  { %v2361_v43 = vpop.f32.mrf.mxu2  ;;  %v2536_v17 = vpop.f32.mrf.mxu3 }
0x13f1   :  { %v2362_v27 = vadd.f32 %v2361_v43, %v2320_v11  ;;  %v4366_v11 = vsub.f32 %v2830_v14, %v4342_v25  ;;  %v3833_v43 = vmov 0  }
0x13f2   :  { %3711 = vset.pattern.permute.xlu1 %v3833_v43  ;;  %3712 = vset.pattern.permute.xlu2 %v3833_v43 }
0x13f3   :  { %v2407_v19 = vadd.f32 %v2406_v15, %v2362_v27  ;;  %v4393_v53 = vand.u32 4294901760, %v4366_v11 }
0x13f5   :  { %v2442_v39 = vadd.f32 %v2441_v24, %v2407_v19 }
0x13f7   :  { %v2475_v1 = vadd.f32 %v2474_v0, %v2442_v39 }
0x13f8   :  { %v2507_v60 = vpop.f32.mrf.mxu2  ;;  %v2540_v13 = vpop.f32.mrf.mxu3 }
0x13f9   :  { %v2508_v20 = vadd.f32 %v2507_v60, %v2469_v35 }
0x13fb   :  { %v4332_v30 = vadd.f32 %v2536_v17, %v2508_v20 }
0x13fd   :  { %v2545_v62 = vand.u32 2147483647, %v4332_v30  ;;  %v2543_v37 = vmax.f32 %v4332_v30, 0.0 }
0x13ff   :  { %v2547_v40 = vsub.f32 0.0, %v2545_v62 }
0x1400   :  { %v2511_v3 = vpop.f32.mrf.mxu2 }
0x1401   :  { %v2549_v7 = vmul.f32 1.442695, %v2547_v40  ;;  %v2512_v9 = vadd.f32 %v2511_v3, %v2475_v1 }
0x1403   :  { %3771 = vpow2.f32 %v2549_v7  ;;  %v4340_v16 = vadd.f32 %v2540_v13, %v2512_v9 }
0x1405   :  { %v2546_v29 = vand.u32 2147483647, %v4340_v16  ;;  %v2544_v6 = vmax.f32 %v4340_v16, 0.0 }
0x1407   :  { %v2548_v33 = vsub.f32 0.0, %v2546_v29 }
0x1409   :  { %v3772_v8 = vpop.eup %3771  ;;  %v2551_v51 = vmul.f32 1.442695, %v2548_v33 }
0x140a   :  { %v2553_v52 = vadd.f32 1.0, %v3772_v8  ;;  %v2884_v8 = vsub.f32 %v4366_v11, %v4393_v53 }
0x140b   :  { %3773 = vpow2.f32 %v2551_v51 }
0x140c   :  { %3775 = vlog2.f32 %v2553_v52  ;;  %v2885_v51 = vand.u32 4294901760, %v2884_v8  ;;  %v4399_v52 = vand.u32 127, %v2768_v50 }
0x140e   :  { %2886 = vmatpush.msra.mxu3 %v2885_v51  ;;  %vm2786_vm15 = vcmp.gt.s32.totalorder %v4399_v52, 0  ;;  %vm3074_vm11 = vcmp.gt.s32.totalorder %v4399_v52, 1  ;;  %vm3348_vm12 = vcmp.gt.s32.totalorder %v4399_v52, 2 }
0x1411   :  { %v3774_v61 = vpop.eup %3773 }
0x1412   :  { %v3776_v63 = vpop.eup %3775  ;;  %v2554_v36 = vadd.f32 1.0, %v3774_v61 }
0x1413   :  { %v2556_v38 = vmul.f32 0.6931472, %v3776_v63 }
0x1414   :  { %3777 = vlog2.f32 %v2554_v36 }
0x1415   :  { %v2559_v48 = vadd.f32 %v2556_v38, %v2543_v37 }
0x1417   :  { %2573 = vrot.lane.b32.xlu0 %v2559_v48, %s3831_s3 }
0x141a   :  { %v3778_v59 = vpop.eup %3777 }
0x141b   :  { %v2558_v41 = vmul.f32 0.6931472, %v3778_v59 }
0x141d   :  { %v2560_v18 = vadd.f32 %v2558_v41, %v2544_v6 }
0x141f   :  { %2575 = vrot.lane.b32.xlu1 %v2560_v18, %s3831_s3  ;;  %2579 = vrot.lane.b32.xlu0 %v4353_v28, %s3832_s27 }
0x1489   :  { %v2574_v47 = vpop.permute.xlu0 %2573 }
0x148a   :  { %v2584_v32 = vsel %vm2583_vm5, %v2574_v47, 0 }
0x148b   :  { %v2608_v55 = vand.u32 4294901760, %v2584_v32 }
0x148d   :  { %v2609_v56 = vsub.f32 %v2584_v32, %v2608_v55  ;;  %2647 = vmatmul.f32.vlgmr.msra.gmra.mxu1 %v2608_v55 }
0x148e   :  { %2941 = vmatpush.msra.mxu1 %v4342_v25 }
0x148f   :  { %v2610_v23 = vand.u32 4294901760, %v2609_v56  ;;  %2675 = vmatmul.f32.vlgmr.msrb.gmra.mxu2 %v2609_v56 }
0x1490   :  { %2973 = vmatpush.msrb.mxu2 %v4393_v53 }
0x1491   :  { %v2611_v57 = vsub.f32 %v2609_v56, %v2610_v23  ;;  %2704 = vmatmul.f32.vlgmr.msrb.gmra.mxu3 %v2610_v23  ;;  %v2576_v58 = vpop.permute.xlu1 %2575  ;;  %v2580_v17 = vpop.permute.xlu0 %2579 }
0x1492   :  { %v2586_v5 = vsel %vm2583_vm5, %v2576_v58, 0  ;;  %2999 = vmatpush.msrb.mxu3 %v4342_v25 }
0x1493   :  { %v2612_v49 = vand.u32 4294901760, %v2611_v57  ;;  %v2616_v34 = vand.u32 4294901760, %v2586_v5 }
0x1495   :  { %v2617_v54 = vsub.f32 %v2586_v5, %v2616_v34  ;;  %2613 = vmatmul.f32.vlgmr.msra.gmra.mxu0 %v2612_v49  ;;  %2651 = vmatmul.f32.gmra.mxu1 %v2616_v34 }
0x1496   :  { %2913 = vmatpush.msra.mxu0 %v4366_v11 }
0x1497   :  { %2680 = vmatmul.f32.gmra.mxu2 %v2617_v54  ;;  %v2618_v22 = vand.u32 4294901760, %v2617_v54 }
0x1499   :  { %2710 = vmatmul.f32.gmra.mxu3 %v2618_v22  ;;  %v2619_v15 = vsub.f32 %v2617_v54, %v2618_v22  ;;  %v3837_v54 = vmov 5  }
0x149a   :  { %3714 = vset.pattern.permute.xlu0 %v3837_v54 }
0x149b   :  { %v2620_v26 = vand.u32 4294901760, %v2619_v15 }
0x149d   :  { %2621 = vmatmul.f32.gmra.mxu0 %v2620_v26  ;;  %2760 = vmatmul.f32.vlgmr.msrb.gmra.mxu1 %v2608_v55 }
0x149e   :  { %3177 = vmatpush.msrb.mxu1 %v2885_v51 }
0x14a5   :  { %2734 = vmatmul.f32.vlgmr.msrb.gmra.mxu0 %v2608_v55  ;;  %2764 = vmatmul.f32.gmra.mxu1 %v2616_v34 }
0x14a6   :  { %3139 = vmatpush.msrb.mxu0 %v4342_v25 }
0x14ad   :  { %2738 = vmatmul.f32.gmra.mxu0 %v2616_v34 }
0x150a   :  { %v2648_v12 = vpop.f32.mrf.mxu1 }
0x1512   :  { %v2614_v27 = vpop.f32.mrf.mxu0  ;;  %v2652_v19 = vpop.f32.mrf.mxu1 }
0x1513   :  { %v2615_v44 = vadd.f32 %v2614_v27, %v2578_v45  ;;  %v2676_v60 = vpop.f32.mrf.mxu2 }
0x1514   :  { %v2705_v62 = vpop.f32.mrf.mxu3 }
0x1515   :  { %v2649_v35 = vadd.f32 %v2648_v12, %v2615_v44 }
0x1517   :  { %v2677_v24 = vadd.f32 %v2676_v60, %v2649_v35 }
0x1519   :  { %v2706_v0 = vadd.f32 %v2705_v62, %v2677_v24 }
0x151a   :  { %v2622_v20 = vpop.f32.mrf.mxu0  ;;  %v2761_v1 = vpop.f32.mrf.mxu1 }
0x151b   :  { %v2623_v39 = vadd.f32 %v2622_v20, %v2580_v17  ;;  %v2681_v4 = vpop.f32.mrf.mxu2 }
0x151c   :  { %v2711_v9 = vpop.f32.mrf.mxu3 }
0x151d   :  { %v2653_v40 = vadd.f32 %v2652_v19, %v2623_v39 }
0x151f   :  { %v2682_v42 = vadd.f32 %v2681_v4, %v2653_v40 }
0x1521   :  { %v2712_v10 = vadd.f32 %v2711_v9, %v2682_v42 }
0x1522   :  { %v2735_v2 = vpop.f32.mrf.mxu0  ;;  %v2765_v21 = vpop.f32.mrf.mxu1 }
0x1523   :  { %v2736_v3 = vadd.f32 %v2735_v2, %v2706_v0 }
0x1525   :  { %v4370_v7 = vadd.f32 %v2761_v1, %v2736_v3 }
0x1527   :  { %3011 = vrot.lane.b32.xlu0 %v4370_v7, %s3834_s0  ;;  %3779 = vrcp.f32 %v4370_v7  ;;  %v2789_v37 = vsel %vm2786_vm15, %v4370_v7, 0.0 }
0x152a   :  { %v2739_v13 = vpop.f32.mrf.mxu0 }
0x152b   :  { %v2740_v14 = vadd.f32 %v2739_v13, %v2712_v10 }
0x152d   :  { %v4375_v29 = vpop.eup %3779  ;;  %v4377_v31 = vadd.f32 %v2765_v21, %v2740_v14 }
0x152e   :  { %2792 = vperm.xlu1 %3711, %v4375_v29  }
0x152f   :  { %3013 = vrot.lane.b32.xlu0 %v4377_v31, %s3834_s0  ;;  %3781 = vrcp.f32 %v4377_v31  ;;  %v2790_v63 = vsel %vm2786_vm15, %v4377_v31, 0.0 }
0x1535   :  { %v4383_v33 = vpop.eup %3781 }
0x1536   :  { %2796 = vperm.xlu2 %3712, %v4383_v33   ;;  %3017 = vrot.lane.b32.xlu1 %v4370_v7, %s3835_s30 }
0x1537   :  { %3713 = vset.pattern.permute.xlu1 %v3837_v54 }
0x153e   :  { %3023 = vrot.lane.b32.xlu2 %v4370_v7, %s3836_s5  ;;  %3019 = vrot.lane.b32.xlu1 %v4377_v31, %s3835_s30 }
0x1546   :  { %3025 = vrot.lane.b32.xlu2 %v4377_v31, %s3836_s5 }
0x1590   :  { %v2797_v61 = vpop.permute.xlu2 %2796 }
0x1591   :  { %v4403_v36 = vmul.f32 %v2797_v61, %v2790_v63 }
0x1593   :  { %v2828_v48 = vsel %vm2583_vm5, %v4403_v36, 0 }
0x1594   :  { %v2857_v41 = vand.u32 4294901760, %v2828_v48 }
0x1596   :  { %v2858_v32 = vsub.f32 %v2828_v48, %v2857_v41 }
0x1598   :  { %v2859_v57 = vand.u32 4294901760, %v2858_v32  ;;  %v3024_v24 = vpop.permute.xlu2 %3023 }
0x1599   :  { %v3012_v43 = vpop.permute.xlu0 %3011 }
0x159a   :  { %v2860_v58 = vsub.f32 %v2858_v32, %v2859_v57  ;;  %v3029_v17 = vsel %vm2583_vm5, %v4370_v7, %v3012_v43 }
0x159c   :  { %v2861_v5 = vand.u32 4294901760, %v2860_v58 }
0x15a0   :  { %v2793_v38 = vpop.permute.xlu1 %2792  ;;  %v3026_v61 = vpop.permute.xlu2 %3025 }
0x15a1   :  { %v4408_v59 = vmul.f32 %v2793_v38, %v2789_v37  ;;  %v3014_v3 = vpop.permute.xlu0 %3013 }
0x15a2   :  { %v3030_v14 = vsel %vm2583_vm5, %v4377_v31, %v3014_v3 }
0x15a3   :  { %v2825_v6 = vsel %vm2583_vm5, %v4408_v59, 0 }
0x15a4   :  { %v2849_v18 = vand.u32 4294901760, %v2825_v6 }
0x15a6   :  { %v2850_v47 = vsub.f32 %v2825_v6, %v2849_v18  ;;  %2888 = vmatmul.f32.vlgmr.msra.gmra.mxu3 %v2849_v18 }
0x15a7   :  { %3232 = vmatpush.msra.mxu3 %v4342_v25 }
0x15a8   :  { %v2851_v55 = vand.u32 4294901760, %v2850_v47  ;;  %2916 = vmatmul.f32.vlgmr.msra.gmra.mxu0 %v2850_v47  ;;  %v3018_v45 = vpop.permute.xlu1 %3017 }
0x15a9   :  { %3264 = vmatpush.msra.mxu0 %v4393_v53  ;;  %v3031_v39 = vsel %vm36_vm0, %v3029_v17, %v3018_v45 }
0x15aa   :  { %2945 = vmatmul.f32.vlgmr.msra.gmra.mxu1 %v2851_v55  ;;  %v2852_v56 = vsub.f32 %v2850_v47, %v2851_v55  ;;  %v3034_v2 = vsel %vm3033_vm6, %v3031_v39, %v3024_v24 }
0x15ab   :  { %3290 = vmatpush.msra.mxu1 %v4342_v25 }
0x15ac   :  { %v2853_v23 = vand.u32 4294901760, %v2852_v56 }
0x15ae   :  { %2854 = vmatmul.f32.vlgmr.msra.gmra.mxu2 %v2853_v23  ;;  %2892 = vmatmul.f32.gmra.mxu3 %v2857_v41 }
0x15af   :  { %3204 = vmatpush.msra.mxu2 %v4366_v11 }
0x15b0   :  { %2921 = vmatmul.f32.gmra.mxu0 %v2858_v32  ;;  %v3020_v42 = vpop.permute.xlu1 %3019 }
0x15b1   :  { %v3032_v8 = vsel %vm36_vm0, %v3030_v14, %v3020_v42 }
0x15b2   :  { %2951 = vmatmul.f32.gmra.mxu1 %v2859_v57  ;;  %v3035_v37 = vsel %vm3033_vm6, %v3032_v8, %v3026_v61 }
0x15b6   :  { %2862 = vmatmul.f32.gmra.mxu2 %v2861_v5  ;;  %3001 = vmatmul.f32.vlgmr.msrb.gmra.mxu3 %v2849_v18 }
0x15b7   :  { %3453 = vmatpush.msrb.mxu3 %v2885_v51 }
0x15be   :  { %2975 = vmatmul.f32.vlgmr.msrb.gmra.mxu2 %v2849_v18  ;;  %3005 = vmatmul.f32.gmra.mxu3 %v2857_v41 }
0x15bf   :  { %3415 = vmatpush.msrb.mxu2 %v4342_v25 }
0x15c6   :  { %2979 = vmatmul.f32.gmra.mxu2 %v2857_v41 }
0x1625   :  { %v2917_v26 = vpop.f32.mrf.mxu0 }
0x1627   :  { %v2946_v44 = vpop.f32.mrf.mxu1 }
0x1629   :  { %v2889_v49 = vpop.f32.mrf.mxu3 }
0x162d   :  { %v2922_v0 = vpop.f32.mrf.mxu0 }
0x162f   :  { %v2952_v9 = vpop.f32.mrf.mxu1 }
0x1631   :  { %v2855_v34 = vpop.f32.mrf.mxu2  ;;  %v2893_v22 = vpop.f32.mrf.mxu3 }
0x1632   :  { %v2890_v15 = vadd.f32 %v2889_v49, %v2855_v34 }
0x1634   :  { %v2918_v27 = vadd.f32 %v2917_v26, %v2890_v15 }
0x1636   :  { %v2947_v35 = vadd.f32 %v2946_v44, %v2918_v27  ;;  %v3839_v44 = vmov 8  }
0x1639   :  { %v2863_v12 = vpop.f32.mrf.mxu2  ;;  %v3002_v60 = vpop.f32.mrf.mxu3 }
0x163a   :  { %v2894_v19 = vadd.f32 %v2893_v22, %v2863_v12 }
0x163c   :  { %v2923_v40 = vadd.f32 %v2922_v0, %v2894_v19 }
0x163e   :  { %v2953_v13 = vadd.f32 %v2952_v9, %v2923_v40 }
0x1641   :  { %v2976_v20 = vpop.f32.mrf.mxu2  ;;  %v3006_v50 = vpop.f32.mrf.mxu3 }
0x1642   :  { %v2977_v62 = vadd.f32 %v2976_v20, %v2947_v35 }
0x1644   :  { %v3003_v1 = vadd.f32 %v3002_v60, %v2977_v62 }
0x1646   :  { %v3036_v4 = vmul.f32 %v3034_v2, %v3003_v1 }
0x1648   :  { %v4422_v10 = vsub.f32 %v4370_v7, %v3036_v4 }
0x1649   :  { %v2980_v21 = vpop.f32.mrf.mxu2 }
0x164a   :  { %v2981_v51 = vadd.f32 %v2980_v21, %v2953_v13  ;;  %3077 = vrot.lane.b32.xlu0 %v4422_v10, %s3831_s3  ;;  %3783 = vrcp.f32 %v4422_v10 }
0x164c   :  { %v3007_v63 = vadd.f32 %v3006_v50, %v2981_v51 }
0x164e   :  { %v3037_v38 = vmul.f32 %v3035_v37, %v3007_v63 }
0x1650   :  { %v4431_v48 = vpop.eup %3783  ;;  %v4434_v6 = vsub.f32 %v4377_v31, %v3037_v38 }
0x1651   :  { %3086 = vperm.xlu1 %3713, %v4431_v48  }
0x1652   :  { %3079 = vrot.lane.b32.xlu2 %v4434_v6, %s3831_s3  ;;  %3785 = vrcp.f32 %v4434_v6 }
0x1658   :  { %v4440_v41 = vpop.eup %3785 }
0x1659   :  { %3300 = vrot.lane.b32.xlu1 %v4422_v10, %s3834_s0  ;;  %3090 = vperm.xlu0 %3714, %v4440_v41  }
0x165a   :  { %3306 = vrot.lane.b32.xlu2 %v4422_v10, %s3835_s30  ;;  %3716 = vset.pattern.permute.xlu1 %v3839_v44 }
0x1661   :  { %3302 = vrot.lane.b32.xlu1 %v4434_v6, %s3834_s0  ;;  %2563 = vrot.lane.b32.xlu0 %v4332_v30, %s3835_s30 }
0x1662   :  { %3308 = vrot.lane.b32.xlu2 %v4434_v6, %s3835_s30 }
0x1669   :  { %2565 = vrot.lane.b32.xlu1 %v4340_v16, %s3835_s30 }
0x16ac   :  { %v3080_v57 = vpop.permute.xlu2 %3079 }
0x16ad   :  { %v3084_v5 = vsel %vm3074_vm11, %v3080_v57, 0.0  ;;  %v3313_v63 = vsel %vm2583_vm5, %v3080_v57, %v4434_v6 }
0x16b4   :  { %v3307_v2 = vpop.permute.xlu2 %3306 }
0x16bc   :  { %v3078_v18 = vpop.permute.xlu0 %3077 }
0x16bd   :  { %v3083_v47 = vsel %vm3074_vm11, %v3078_v18, 0.0  ;;  %v3312_v0 = vsel %vm2583_vm5, %v3078_v18, %v4422_v10 }
0x16c3   :  { %v3087_v32 = vpop.permute.xlu1 %3086 }
0x16c4   :  { %v4456_v55 = vmul.f32 %v3087_v32, %v3083_v47  ;;  %v3309_v32 = vpop.permute.xlu2 %3308 }
0x16c6   :  { %v3118_v56 = vsel %vm2583_vm5, %v4456_v55, 0 }
0x16c7   :  { %v3140_v23 = vand.u32 4294901760, %v3118_v56 }
0x16c9   :  { %v3141_v58 = vsub.f32 %v3118_v56, %v3140_v23  ;;  %3179 = vmatmul.f32.vlgmr.msrb.gmra.mxu1 %v3140_v23 }
0x16ca   :  { %3508 = vmatpush.msrb.mxu1 %v4342_v25 }
0x16cb   :  { %v3142_v30 = vand.u32 4294901760, %v3141_v58  ;;  %3207 = vmatmul.f32.vlgmr.msra.gmra.mxu2 %v3141_v58  ;;  %v3091_v16 = vpop.permute.xlu0 %3090  ;;  %v3301_v20 = vpop.permute.xlu1 %3300 }
0x16cc   :  { %v4461_v49 = vmul.f32 %v3091_v16, %v3084_v5  ;;  %3540 = vmatpush.msra.mxu2 %v4393_v53  ;;  %v3314_v3 = vsel %vm36_vm0, %v3312_v0, %v3301_v20 }
0x16cd   :  { %v3143_v34 = vsub.f32 %v3141_v58, %v3142_v30  ;;  %3236 = vmatmul.f32.vlgmr.msra.gmra.mxu3 %v3142_v30  ;;  %v3316_v14 = vsel %vm3033_vm6, %v3314_v3, %v3307_v2  ;;  %v3841_v2 = vmov 9  }
0x16ce   :  { %v3121_v54 = vsel %vm2583_vm5, %v4461_v49, 0  ;;  %3566 = vmatpush.msra.mxu3 %v4342_v25  ;;  %v3838_v25 = vmov 10  }
0x16cf   :  { %v3144_v22 = vand.u32 4294901760, %v3143_v34  ;;  %v3148_v15 = vand.u32 4294901760, %v3121_v54  ;;  %3715 = vset.pattern.permute.xlu0 %v3838_v25  ;;  %3717 = vset.pattern.permute.xlu2 %v3838_v25 }
0x16d1   :  { %v3149_v26 = vsub.f32 %v3121_v54, %v3148_v15  ;;  %3145 = vmatmul.f32.vlgmr.msrb.gmra.mxu0 %v3144_v22  ;;  %3183 = vmatmul.f32.gmra.mxu1 %v3148_v15 }
0x16d2   :  { %3480 = vmatpush.msrb.mxu0 %v4366_v11 }
0x16d3   :  { %3212 = vmatmul.f32.gmra.mxu2 %v3149_v26  ;;  %v3150_v12 = vand.u32 4294901760, %v3149_v26  ;;  %v3303_v8 = vpop.permute.xlu1 %3302  ;;  %v2564_v5 = vpop.permute.xlu0 %2563 }
0x16d4   :  { %v3315_v38 = vsel %vm36_vm0, %v3313_v63, %v3303_v8  ;;  %v4496_v34 = vsub.f32 %v4359_v46, %v2564_v5 }
0x16d5   :  { %3242 = vmatmul.f32.gmra.mxu3 %v3150_v12  ;;  %v3151_v43 = vsub.f32 %v3149_v26, %v3150_v12 }
0x16d7   :  { %v3152_v27 = vand.u32 4294901760, %v3151_v43 }
0x16d9   :  { %3153 = vmatmul.f32.gmra.mxu0 %v3152_v27  ;;  %3292 = vmatmul.f32.vlgmr.msra.gmra.mxu1 %v3140_v23 }
0x16db   :  { %v2566_v54 = vpop.permute.xlu1 %2565 }
0x16dc   :  { %v4501_v22 = vsub.f32 %v4353_v28, %v2566_v54 }
0x16e1   :  { %3266 = vmatmul.f32.vlgmr.msra.gmra.mxu0 %v3140_v23  ;;  %3296 = vmatmul.f32.gmra.mxu1 %v3148_v15  ;;  %v3317_v23 = vsel %vm3033_vm6, %v3315_v38, %v3309_v32 }
0x16e9   :  { %3270 = vmatmul.f32.gmra.mxu0 %v3148_v15 }
0x1746   :  { %v3180_v53 = vpop.f32.mrf.mxu1 }
0x174e   :  { %v3146_v45 = vpop.f32.mrf.mxu0  ;;  %v3184_v11 = vpop.f32.mrf.mxu1 }
0x174f   :  { %v3181_v19 = vadd.f32 %v3180_v53, %v3146_v45  ;;  %v3208_v35 = vpop.f32.mrf.mxu2 }
0x1750   :  { %v3237_v24 = vpop.f32.mrf.mxu3 }
0x1751   :  { %v3209_v60 = vadd.f32 %v3208_v35, %v3181_v19 }
0x1753   :  { %v3238_v39 = vadd.f32 %v3237_v24, %v3209_v60 }
0x1756   :  { %v3154_v17 = vpop.f32.mrf.mxu0  ;;  %v3293_v40 = vpop.f32.mrf.mxu1 }
0x1757   :  { %v3185_v62 = vadd.f32 %v3184_v11, %v3154_v17  ;;  %v3213_v42 = vpop.f32.mrf.mxu2 }
0x1758   :  { %v3243_v51 = vpop.f32.mrf.mxu3 }
0x1759   :  { %v3214_v9 = vadd.f32 %v3213_v42, %v3185_v62 }
0x175b   :  { %v3244_v50 = vadd.f32 %v3243_v51, %v3214_v9 }
0x175e   :  { %v3267_v1 = vpop.f32.mrf.mxu0  ;;  %v3297_v47 = vpop.f32.mrf.mxu1 }
0x175f   :  { %v3268_v4 = vadd.f32 %v3267_v1, %v3238_v39 }
0x1761   :  { %v3294_v13 = vadd.f32 %v3293_v40, %v3268_v4 }
0x1763   :  { %v3318_v21 = vmul.f32 %v3316_v14, %v3294_v13 }
0x1765   :  { %v4475_v61 = vsub.f32 %v4422_v10, %v3318_v21 }
0x1766   :  { %v3271_v37 = vpop.f32.mrf.mxu0 }
0x1767   :  { %v3272_v18 = vadd.f32 %v3271_v37, %v3244_v50  ;;  %3351 = vrot.lane.b32.xlu2 %v4475_v61, %s3840_s6  ;;  %3787 = vrcp.f32 %v4475_v61 }
0x1769   :  { %v3298_v56 = vadd.f32 %v3297_v47, %v3272_v18 }
0x176b   :  { %v3319_v58 = vmul.f32 %v3317_v23, %v3298_v56 }
0x176d   :  { %v4484_v30 = vpop.eup %3787  ;;  %v4487_v57 = vsub.f32 %v4434_v6, %v3319_v58 }
0x176e   :  { %3361 = vperm.xlu0 %3715, %v4484_v30  }
0x176f   :  { %3353 = vrot.lane.b32.xlu1 %v4487_v57, %s3840_s6  ;;  %3789 = vrcp.f32 %v4487_v57 }
0x1775   :  { %v4493_v16 = vpop.eup %3789 }
0x1776   :  { %3366 = vperm.xlu2 %3717, %v4493_v16   ;;  %3720 = vset.pattern.permute.xlu0 %v3841_v2 }
0x1777   :  { %2803 = vperm.xlu1 %3716, %v4496_v34  }
0x177e   :  { %3718 = vset.pattern.permute.xlu2 %v3839_v44 }
0x177f   :  { %2808 = vperm.xlu2 %3718, %v4501_v22  }
0x1787   :  { %3719 = vset.pattern.permute.xlu2 %v3841_v2 }
0x17c1   :  { %v4504_v15 = vpop.permute.xlu2 %3351 }
0x17c2   :  { %v3357_v46 = vsel %vm3348_vm12, %v4504_v15, 0.0 }
0x17d0   :  { %v3367_v26 = vpop.permute.xlu2 %3366 }
0x17d9   :  { %v2809_v12 = vpop.permute.xlu2 %2808 }
0x17da   :  { %v2812_v43 = vmul.f32 %v2809_v12, %v4403_v36 }
0x17dc   :  { %2817 = vrot.lane.b32.xlu1 %v2812_v43, %s3835_s30 }
0x17e0   :  { %v3362_v27 = vpop.permute.xlu0 %3361 }
0x17e1   :  { %v4510_v53 = vmul.f32 %v3362_v27, %v3357_v46  ;;  %v4512_v28 = vpop.permute.xlu1 %3353 }
0x17e2   :  { %v3358_v45 = vsel %vm3348_vm12, %v4512_v28, 0.0 }
0x17e3   :  { %v3394_v44 = vsel %vm2583_vm5, %v4510_v53, 0  ;;  %v4517_v11 = vmul.f32 %v3367_v26, %v3358_v45 }
0x17e4   :  { %v3416_v19 = vand.u32 4294901760, %v3394_v44 }
0x17e5   :  { %v3397_v36 = vsel %vm2583_vm5, %v4517_v11, 0 }
0x17e6   :  { %v3417_v35 = vsub.f32 %v3394_v44, %v3416_v19  ;;  %v3424_v52 = vand.u32 4294901760, %v3397_v36  ;;  %3455 = vmatmul.f32.vlgmr.msrb.gmra.mxu3 %v3416_v19 }
0x17e8   :  { %v3418_v17 = vand.u32 4294901760, %v3417_v35  ;;  %3483 = vmatmul.f32.vlgmr.msrb.gmra.mxu0 %v3417_v35  ;;  %v3425_v60 = vsub.f32 %v3397_v36, %v3424_v52 }
0x17e9   :  { %v2804_v20 = vpop.permute.xlu1 %2803 }
0x17ea   :  { %v3419_v24 = vsub.f32 %v3417_v35, %v3418_v17  ;;  %v2811_v39 = vmul.f32 %v2804_v20, %v4408_v59  ;;  %3512 = vmatmul.f32.vlgmr.msrb.gmra.mxu1 %v3418_v17  ;;  %v3426_v0 = vand.u32 4294901760, %v3425_v60 }
0x17ec   :  { %v3420_v62 = vand.u32 4294901760, %v3419_v24  ;;  %2815 = vrot.lane.b32.xlu0 %v2811_v39, %s3835_s30  ;;  %v3427_v40 = vsub.f32 %v3425_v60, %v3426_v0 }
0x17ee   :  { %3421 = vmatmul.f32.vlgmr.msrb.gmra.mxu2 %v3420_v62  ;;  %3459 = vmatmul.f32.gmra.mxu3 %v3424_v52  ;;  %v3428_v1 = vand.u32 4294901760, %v3427_v40 }
0x17f0   :  { %3488 = vmatmul.f32.gmra.mxu0 %v3425_v60 }
0x17f2   :  { %3518 = vmatmul.f32.gmra.mxu1 %v3426_v0 }
0x17f6   :  { %3429 = vmatmul.f32.gmra.mxu2 %v3428_v1  ;;  %3568 = vmatmul.f32.vlgmr.msra.gmra.mxu3 %v3416_v19 }
0x17fe   :  { %3542 = vmatmul.f32.vlgmr.msra.gmra.mxu2 %v3416_v19  ;;  %3572 = vmatmul.f32.gmra.mxu3 %v3424_v52 }
0x1806   :  { %3546 = vmatmul.f32.gmra.mxu2 %v3424_v52 }
0x184e   :  { %v2818_v59 = vpop.permute.xlu1 %2817 }
0x184f   :  { %v4524_v3 = vsub.f32 %v4501_v22, %v2818_v59 }
0x1851   :  { %3102 = vperm.xlu0 %3720, %v4524_v3  }
0x1859   :  { %3582 = vrot.lane.b32.xlu0 %v4475_v61, %s3834_s0 }
0x185a   :  { %3722 = vset.pattern.permute.xlu0 %v3838_v25 }
0x185e   :  { %v2816_v4 = vpop.permute.xlu0 %2815 }
0x185f   :  { %v4531_v42 = vsub.f32 %v4496_v34, %v2816_v4 }
0x1861   :  { %3097 = vperm.xlu2 %3719, %v4531_v42  }
0x1865   :  { %v3484_v38 = vpop.f32.mrf.mxu0 }
0x1867   :  { %v3513_v56 = vpop.f32.mrf.mxu1 }
0x1869   :  { %3721 = vset.pattern.permute.xlu2 %v3838_v25  ;;  %v3456_v9 = vpop.f32.mrf.mxu3 }
0x186f   :  { %v3519_v17 = vpop.f32.mrf.mxu1 }
0x1871   :  { %v3422_v13 = vpop.f32.mrf.mxu2  ;;  %v3460_v14 = vpop.f32.mrf.mxu3 }
0x1879   :  { %v3430_v21 = vpop.f32.mrf.mxu2  ;;  %v3569_v54 = vpop.f32.mrf.mxu3 }
0x187a   :  { %v3461_v8 = vadd.f32 %v3460_v14, %v3430_v21  ;;  %v3052_v21 = vmul.f32 %v4531_v42, %v4531_v42 }
0x1881   :  { %v3543_v23 = vpop.f32.mrf.mxu2  ;;  %v3573_v0 = vpop.f32.mrf.mxu3 }
0x1889   :  { %v3547_v60 = vpop.f32.mrf.mxu2 }
0x18bb   :  { %v3098_v51 = vpop.permute.xlu2 %3097 }
0x18bc   :  { %v3105_v50 = vmul.f32 %v3098_v51, %v4456_v55 }
0x18be   :  { %3109 = vrot.lane.b32.xlu1 %v3105_v50, %s3835_s30 }
0x18c3   :  { %v3103_v63 = vpop.permute.xlu0 %3102 }
0x18c4   :  { %v3106_v37 = vmul.f32 %v3103_v63, %v4461_v49  ;;  %v3457_v49 = vadd.f32 %v3456_v9, %v3422_v13 }
0x18c6   :  { %3576 = vrot.lane.b32.xlu1 %v4475_v61, %s3831_s3  ;;  %3111 = vrot.lane.b32.xlu2 %v3106_v37, %s3835_s30  ;;  %v3485_v18 = vadd.f32 %v3484_v38, %v3457_v49 }
0x18c8   :  { %v3514_v58 = vadd.f32 %v3513_v56, %v3485_v18 }
0x18ca   :  { %v3544_v5 = vadd.f32 %v3543_v23, %v3514_v58 }
0x18cb   :  { %v3583_v43 = vpop.permute.xlu0 %3582 }
0x18cc   :  { %v3570_v12 = vadd.f32 %v3569_v54, %v3544_v5 }
0x18ce   :  { %3584 = vrot.lane.b32.xlu1 %v4487_v57, %s3834_s0  ;;  %3578 = vrot.lane.b32.xlu2 %v4487_v57, %s3831_s3 }
0x18d6   :  { %3056 = vrot.lane.b32.xlu1 %v4431_v48, %s3834_s0 }
0x1920   :  { %v3112_v55 = vpop.permute.xlu2 %3111 }
0x1921   :  { %v4548_v25 = vsub.f32 %v4524_v3, %v3112_v55 }
0x1923   :  { %3378 = vperm.xlu0 %3722, %v4548_v25  }
0x1928   :  { %v3579_v52 = vpop.permute.xlu2 %3578 }
0x1929   :  { %v3589_v24 = vsel %vm2583_vm5, %v4512_v28, %v3579_v52 }
0x1930   :  { %v3110_v47 = vpop.permute.xlu1 %3109 }
0x1931   :  { %v4552_v32 = vsub.f32 %v4531_v42, %v3110_v47 }
0x1933   :  { %3373 = vperm.xlu2 %3721, %v4552_v32  }
0x1938   :  { %v3577_v48 = vpop.permute.xlu1 %3576 }
0x1939   :  { %v3588_v26 = vsel %vm2583_vm5, %v4504_v15, %v3577_v48  ;;  %v3334_v15 = vmul.f32 %v4552_v32, %v4552_v32 }
0x193a   :  { %v3590_v46 = vsel %vm36_vm0, %v3588_v26, %v4475_v61 }
0x193b   :  { %v3592_v27 = vsel %vm3033_vm6, %v3590_v46, %v3583_v43  ;;  %3058 = vrot.lane.b32.xlu2 %v4440_v41, %s3834_s0  ;;  %v3336_v36 = vmul.f32 %v4484_v30, %v3334_v15  ;;  %v3489_v41 = vpop.f32.mrf.mxu0 }
0x193c   :  { %v3594_v45 = vmul.f32 %v3592_v27, %v3570_v12  ;;  %v3490_v35 = vadd.f32 %v3489_v41, %v3461_v8 }
0x193e   :  { %v4563_v44 = vsub.f32 %v4475_v61, %v3594_v45  ;;  %v3520_v20 = vadd.f32 %v3519_v17, %v3490_v35 }
0x1940   :  { %3791 = vrcp.f32 %v4563_v44  ;;  %v3548_v39 = vadd.f32 %v3547_v60, %v3520_v20  ;;  %v3585_v62 = vpop.permute.xlu1 %3584 }
0x1942   :  { %v3574_v40 = vadd.f32 %v3573_v0, %v3548_v39 }
0x1946   :  { %v3792_v19 = vpop.eup %3791 }
0x1947   :  { %3614 = vrot.lane.b32.xlu0 %v3792_v19, %s3831_s3 }
0x1948   :  { %v3057_v14 = vpop.permute.xlu1 %3056 }
0x1949   :  { %v3062_v8 = vmul.f32 %v3057_v14, %v3052_v21 }
0x194f   :  { %2778 = vrot.lane.b32.xlu0 %v4383_v33, %s3835_s30  ;;  %v3591_v33 = vsel %vm36_vm0, %v3589_v24, %v4487_v57  ;;  %vm3646_vm0 = vcmask 7168  }
0x1950   :  { %v3593_v30 = vsel %vm3033_vm6, %v3591_v33, %v3585_v62 }
0x1951   :  { %v3595_v1 = vmul.f32 %v3593_v30, %v3574_v40 }
0x1953   :  { %v3597_v2 = vsub.f32 %v4487_v57, %v3595_v1 }
0x1955   :  { %3793 = vrcp.f32 %v3597_v2 }
0x1957   :  { %3340 = vrot.lane.b32.xlu0 %v3336_v36, %s3842_s7 }
0x195b   :  { %v3794_v13 = vpop.eup %3793 }
0x198d   :  { %v3374_v59 = vpop.permute.xlu2 %3373 }
0x198e   :  { %v3381_v4 = vmul.f32 %v3374_v59, %v4510_v53  ;;  %v3335_v53 = vmul.f32 %v4548_v25, %v4548_v25 }
0x1990   :  { %3385 = vrot.lane.b32.xlu1 %v3381_v4, %s3835_s30  ;;  %v3337_v63 = vmul.f32 %v4493_v16, %v3335_v53 }
0x1995   :  { %v3379_v9 = vpop.permute.xlu0 %3378  ;;  %v3059_v51 = vpop.permute.xlu2 %3058 }
0x1996   :  { %v3382_v28 = vmul.f32 %v3379_v9, %v4517_v11  ;;  %v3053_v11 = vmul.f32 %v4524_v3, %v4524_v3 }
0x1998   :  { %3616 = vrot.lane.b32.xlu1 %v3794_v13, %s3831_s3  ;;  %3387 = vrot.lane.b32.xlu2 %v3382_v28, %s3835_s30  ;;  %v3063_v50 = vmul.f32 %v3059_v51, %v3053_v11 }
0x19a0   :  { %3066 = vrot.lane.b32.xlu1 %v3062_v8, %s3843_s8  ;;  %2776 = vrot.lane.b32.xlu2 %v4375_v29, %s3835_s30 }
0x19a8   :  { %3342 = vrot.lane.b32.xlu1 %v3337_v63, %s3842_s7  ;;  %3068 = vrot.lane.b32.xlu2 %v3063_v50, %s3843_s8 }
0x19b0   :  { %3044 = vrot.lane.b32.xlu1 %v4422_v10, %s3844_s9 }
0x19b8   :  { %3328 = vrot.lane.b32.xlu1 %v4487_v57, %s3845_s10 }
0x19b9   :  { %v3615_v3 = vpop.permute.xlu0 %3614 }
0x19c1   :  { %v2779_v57 = vpop.permute.xlu0 %2778 }
0x19c9   :  { %v3341_v5 = vpop.permute.xlu0 %3340 }
0x19f2   :  { %v3388_v29 = vpop.permute.xlu2 %3387 }
0x19f3   :  { %v3392_v55 = vsub.f32 %v4548_v25, %v3388_v29  ;;  %v2772_v25 = vmul.f32 %v4496_v34, %v4496_v34 }
0x19f5   :  { %v3611_v18 = vmul.f32 %v3392_v55, %v3392_v55 }
0x19fa   :  { %v2777_v10 = vpop.permute.xlu2 %2776 }
0x19fb   :  { %v2782_v23 = vmul.f32 %v2777_v10, %v2772_v25 }
0x1a02   :  { %v3386_v42 = vpop.permute.xlu1 %3385 }
0x1a03   :  { %v3391_v37 = vsub.f32 %v4552_v32, %v3386_v42  ;;  %v3069_v32 = vpop.permute.xlu2 %3068 }
0x1a05   :  { %v3610_v49 = vmul.f32 %v3391_v37, %v3391_v37 }
0x1a07   :  { %v3620_v38 = vmul.f32 %v3615_v3, %v3610_v49 }
0x1a09   :  { %3624 = vrot.lane.b32.xlu2 %v3620_v38, %s3846_s11 }
0x1a0a   :  { %v3617_v16 = vpop.permute.xlu1 %3616 }
0x1a0b   :  { %v3621_v47 = vmul.f32 %v3617_v16, %v3611_v18 }
0x1a0d   :  { %3626 = vrot.lane.b32.xlu0 %v3621_v47, %s3846_s11 }
0x1a11   :  { %3046 = vrot.lane.b32.xlu2 %v4434_v6, %s3844_s9  ;;  %v2773_v6 = vmul.f32 %v4501_v22, %v4501_v22 }
0x1a12   :  { %v3067_v56 = vpop.permute.xlu1 %3066 }
0x1a13   :  { %v3072_v58 = vadd.f32 %v3067_v56, %v2782_v23 }
0x1a15   :  { %3326 = vrot.lane.b32.xlu0 %v4475_v61, %s3845_s10  ;;  %v3346_v48 = vadd.f32 %v3341_v5, %v3072_v58  ;;  %v2783_v61 = vmul.f32 %v2779_v57, %v2773_v6 }
0x1a17   :  { %v3073_v43 = vadd.f32 %v3069_v32, %v2783_v61 }
0x1a19   :  { %3602 = vrot.lane.b32.xlu2 %v4563_v44, %s3847_s12 }
0x1a1a   :  { %v3343_v12 = vpop.permute.xlu1 %3342 }
0x1a1b   :  { %v3347_v46 = vadd.f32 %v3343_v12, %v3073_v43 }
0x1a1d   :  { %3604 = vrot.lane.b32.xlu0 %v3597_v2, %s3847_s12 }
0x1a22   :  { %v3045_v34 = vpop.permute.xlu1 %3044 }
0x1a23   :  { %v3050_v15 = vmul.f32 %v3045_v34, %v4370_v7 }
0x1a2a   :  { %v3329_v35 = vpop.permute.xlu1 %3328 }
0x1a63   :  { %v3625_v54 = vpop.permute.xlu2 %3624 }
0x1a64   :  { %v3630_v26 = vadd.f32 %v3625_v54, %v3346_v48 }
0x1a66   :  { %3638 = vrot.lane.b32.xlu1 %v3630_v26, %s3840_s6 }
0x1a6b   :  { %v3047_v44 = vpop.permute.xlu2 %3046 }
0x1a6c   :  { %v3051_v36 = vmul.f32 %v3047_v44, %v4377_v31 }
0x1a6e   :  { %v3333_v60 = vmul.f32 %v3329_v35, %v3051_v36 }
0x1a73   :  { %v3603_v52 = vpop.permute.xlu2 %3602 }
0x1a7f   :  { %v3627_v27 = vpop.permute.xlu0 %3626 }
0x1a80   :  { %v3631_v45 = vadd.f32 %v3627_v27, %v3347_v46 }
0x1a82   :  { %3640 = vrot.lane.b32.xlu2 %v3631_v45, %s3840_s6 }
0x1a87   :  { %v3327_v19 = vpop.permute.xlu0 %3326 }
0x1a88   :  { %v3332_v41 = vmul.f32 %v3327_v19, %v3050_v15 }
0x1a8a   :  { %v3608_v22 = vmul.f32 %v3603_v52, %v3332_v41 }
0x1a8c   :  { %3795 = vlog2.f32 %v3608_v22 }
0x1a8f   :  { %v3605_v17 = vpop.permute.xlu0 %3604 }
0x1a90   :  { %v3609_v20 = vmul.f32 %v3605_v17, %v3333_v60 }
0x1a92   :  { %3797 = vlog2.f32 %v3609_v20  ;;  %v3796_v24 = vpop.eup %3795 }
0x1a93   :  { %v3633_v33 = vmul.f32 0.6931472, %v3796_v24 }
0x1a98   :  { %v3798_v39 = vpop.eup %3797 }
0x1a99   :  { %v3635_v30 = vmul.f32 0.6931472, %v3798_v39 }
0x1ad8   :  { %v3639_v62 = vpop.permute.xlu1 %3638 }
0x1ad9   :  { %v3644_v0 = vadd.f32 %v3639_v62, %v3633_v33 }
0x1adb   :  { %v3647_v1 = vsel %vm3646_vm0, %v3644_v0, 0.0 }
0x1adc   :  { %v3641_v40 = vpop.permute.xlu2 %3640 }
0x1add   :  { %v3645_v7 = vadd.f32 %v3641_v40, %v3635_v30 }
0x1adf   :  { %v3648_v31 = vsel %vm3646_vm0, %v3645_v7, 0.0 }
0x1ae0   :  { %v3649_v2 = vadd.f32 %v3648_v31, %v3647_v1 }
0x1ae2   :  { %3650 = vadd.xlane.f32.xlu0 %v3649_v2 }
0x1b55   :  { %v3651_v59 = vpop.xlane.xlu0 %3650 }
0x1b56   :  { %v3652_v4 = vrot.slane %v3651_v59, 4 }
0x1b58   :  { %v3653_v9 = vadd.f32 %v3652_v4, %v3651_v59 }
0x1b5a   :  { %v3654_v28 = vrot.slane %v3653_v9, 2 }
0x1b5c   :  { %v3655_v13 = vadd.f32 %v3654_v28, %v3653_v9 }
0x1b5e   :  { %v3656_v14 = vrot.slane %v3655_v13, 1 }
0x1b60   :  { %v3657_v21 = vadd.f32 %v3656_v14, %v3655_v13 }
0x1b62   :  { %3688 = vpush %v3657_v21 }
0x1b93   :  { %s3689_s13 = spop %3688 }
0x1b94   :  { %v3659_v8 = vstv %s3689_s13 }
0x1b95   :  { %v3660_v53 = vmul.f32 0.0078125, %v3659_v8 }
0x1b97   :  { %v3661_v51 = vsub.f32 -0.9189385, %v3660_v53 }
0x1b99   :  { %3663 = vst.msk [vmem:[#allocation2] sm:$0x1] %vm3662_vm13, %v3661_v51 }
0x1b9a   :  { %3674 = dma.vmem_to_hbm [thread:$0]  %s3670_s15, 16, %s3672_s18, [#allocation3]  }
0x1b9b   :  { %3826 = dma.done.wait [#allocation3], 16  }
0x1b9c   :  { %3827 = vsyncadd [#allocation3], 4294967280 }
0x1b9d   :  { %3679 = vsyncpa [#allocation3], 1 }

</bundles_post_ra>
